<compile_context>
chip_gen: v6e
topology: v6e:2x2x1
jax: 0.10.0
libtpu: 0.0.40
codegen_flags: <defaults>
</compile_context>

<pallas_src>
import functools
import math

import numpy as np
import jax
import jax.numpy as jnp
from jax import lax
from jax.experimental import pallas as pl
from jax.experimental.pallas import tpu as pltpu

EPS = 1e-5
NUM_ACTIONS = 4


# ----------------------------------------------------------------------------
# Layout constants for the zero-padded, lane-flattened activation layout.
# ----------------------------------------------------------------------------
def _layout(field_size):
    H = W = field_size
    Wp = W + 2                                # padded row stride
    L = (H + 2) * Wp                          # flattened padded image length
    lanes = max(128, ((L + 127) // 128) * 128)
    margin = ((Wp + 1 + 7) // 8) * 8          # >= max |conv tap lane offset|
    return H, W, Wp, L, lanes, margin


# ----------------------------------------------------------------------------
# Fused whole-network kernel (one batch element per grid step).
# ----------------------------------------------------------------------------
def make_fused_kernel(num_blocks, H, W, lanes, margin, tap_stride, use_softmax):
    Wp = W + 2
    taps = [(kh, kw) for kh in range(3) for kw in range(3)]
    inv_sqrt2 = 1.0 / math.sqrt(2.0)

    def kernel(*args):
        x_ref, mask_ref, g0_ref, b0_ref = args[:4]
        layer_refs = [args[4 + 4 * i: 8 + 4 * i] for i in range(num_blocks)]
        wd_ref, bd_ref, o_ref, act_buf, pat_buf = args[4 + 4 * num_blocks:]

        cin0 = x_ref.shape[1]
        mask = mask_ref[...]                       # (1, lanes): 1.0 at interior

        # Scratch init: pads/margins must be zero; unused im2col rows must be
        # finite (their weight columns are zero, so they contribute nothing).
        act_buf[...] = jnp.zeros_like(act_buf)
        pat_buf[...] = jnp.zeros_like(pat_buf)

        # ---- place input (C, H, W) rows into the padded flat lane layout ----
        for c in range(cin0):
            for h in range(H):
                start = margin + (h + 1) * Wp + 1
                act_buf[c:c + 1, start:start + W] = x_ref[0, c, h:h + 1, :]

        def group_norm(v, n, gamma, beta):
            # GroupNorm(num_groups=1): stats over all channels + spatial.
            # Single pass (E[x^2]-mean^2); zero pads contribute 0 to both sums,
            # n counts interior elements only.  Fine at these magnitudes.
            s1 = jnp.sum(v)
            s2 = jnp.sum(v * v)
            mean = s1 / n
            var = s2 / n - mean * mean
            inv = lax.rsqrt(var + EPS)
            return (v - mean) * inv * gamma + beta

        # ---- initial GroupNorm(1, num_frames) ----
        act = act_buf[0:cin0, margin:margin + lanes]           # (Cin, lanes)
        act = group_norm(act, float(cin0 * H * W), g0_ref[...], b0_ref[...]) * mask

        # ---- ConvBlocks: conv3x3 'same' (im2col -> MXU) + GN(1,C) + GELU ----
        cin = cin0
        for (w_ref, bias_ref, gm_ref, bt_ref) in layer_refs:
            cout = w_ref.shape[0]
            # current activation (zero pads) into the haloed scratch buffer
            act_buf[0:cin, margin:margin + lanes] = act
            # im2col: each tap is a constant lane offset -> shifted slice
            for t, (kh, kw) in enumerate(taps):
                d = (kh - 1) * Wp + (kw - 1)
                pat_buf[t * tap_stride:t * tap_stride + cin, :] = (
                    act_buf[0:cin, margin + d:margin + d + lanes])
            y = jnp.dot(w_ref[...], pat_buf[...],
                        preferred_element_type=jnp.float32)     # (cout, lanes)
            y = (y + bias_ref[...]) * mask                      # conv bias, zero pads
            z = group_norm(y, float(cout * H * W), gm_ref[...], bt_ref[...])
            # exact (erf) GELU -- matches torch.nn.GELU default.
            z = 0.5 * z * (1.0 + lax.erf(z * inv_sqrt2))
            act = z * mask
            cin = cout
            # TODO(synk): Dropout(p=dropout_rate) is identity at inference.

        # ---- Flatten + Linear(+Softmax): 4 dot products on the VPU ----------
        ls = []
        for a in range(NUM_ACTIONS):
            la = jnp.sum(act * wd_ref[a]) + bd_ref[:, a:a + 1]   # (1, 1)
            ls.append(la)
        if use_softmax:
            m = ls[0]
            for a in range(1, NUM_ACTIONS):
                m = jnp.maximum(m, ls[a])
            es = [jnp.exp(l - m) for l in ls]
            s = es[0]
            for e in es[1:]:
                s = s + e
            ls = [e / s for e in es]
        for a in range(NUM_ACTIONS):
            o_ref[0, :, a:a + 1] = ls[a].astype(o_ref.dtype)

    return kernel


# ----------------------------------------------------------------------------
# Parameters: torch-layout init + one-time repack into the kernel layout.
# ----------------------------------------------------------------------------
def init_params(key, field_size, num_layers, num_frames, num_channels):
    """Deterministic parameters in PyTorch state_dict layouts."""
    n_blocks = num_layers + 1
    keys = iter(jax.random.split(key, 4 * n_blocks + 4))
    params = {
        "gn0_gamma": 1.0 + 0.1 * jax.random.normal(next(keys), (num_frames,), jnp.float32),
        "gn0_beta": 0.1 * jax.random.normal(next(keys), (num_frames,), jnp.float32),
    }
    blocks = []
    cin = num_frames
    for _ in range(n_blocks):
        cout = num_channels
        w = 0.1 * jax.random.normal(next(keys), (cout, cin, 3, 3), jnp.float32)
        b = 0.1 * jax.random.normal(next(keys), (cout,), jnp.float32)
        g = 1.0 + 0.1 * jax.random.normal(next(keys), (cout,), jnp.float32)
        be = 0.1 * jax.random.normal(next(keys), (cout,), jnp.float32)
        blocks.append((w, b, g, be))
        cin = cout
    params["blocks"] = blocks
    in_features = num_channels * field_size * field_size
    params["fc_w"] = 0.1 * jax.random.normal(next(keys), (NUM_ACTIONS, in_features),
                                             jnp.float32)   # torch Linear: (out, in)
    params["fc_b"] = 0.1 * jax.random.normal(next(keys), (NUM_ACTIONS,), jnp.float32)
    return params


def pack_params(raw, field_size):
    """Repack torch-layout params into the kernel's lane-flattened layout.

    - Conv weight (Cout, Cin, 3, 3) -> (Cout, 9*tap_stride): column
      (kh*3 + kw)*tap_stride + ci holds weight[co, ci, kh, kw]; unused cols = 0.
    - Per-channel vectors (C,) -> (C, 1) for lane broadcasting.
    - Linear weight (4, C*H*W) (torch layout, NCHW flatten order) ->
      (4, C, lanes): weight of feature (c, h, w) at padded-flat lane
      (h+1)*(W+2) + (w+1); all pad/tail lanes are zero.
    - Linear bias (4,) -> (1, 4).
    """
    H, W, Wp, L, lanes, _ = _layout(field_size)
    blocks = raw["blocks"]
    cmax = max(max(b[0].shape[0], b[0].shape[1]) for b in blocks)
    tap_stride = ((cmax + 7) // 8) * 8

    packed_blocks = []
    for (w, b, g, be) in blocks:
        cout, cin = w.shape[0], w.shape[1]
        wt = jnp.transpose(w, (0, 2, 3, 1))                         # (Cout,3,3,Cin)
        wt = jnp.pad(wt, ((0, 0), (0, 0), (0, 0), (0, tap_stride - cin)))
        w_mat = wt.reshape(cout, 9 * tap_stride)
        packed_blocks.append((w_mat, b.reshape(cout, 1),
                              g.reshape(cout, 1), be.reshape(cout, 1)))

    cch = blocks[-1][0].shape[0]
    w3 = raw["fc_w"].reshape(NUM_ACTIONS, cch, H, W)
    w3 = jnp.pad(w3, ((0, 0), (0, 0), (1, 1), (1, 1)))
    wd = w3.reshape(NUM_ACTIONS, cch, L)
    wd = jnp.pad(wd, ((0, 0), (0, 0), (0, lanes - L)))

    m2 = np.zeros((H + 2, Wp), np.float32)
    m2[1:H + 1, 1:W + 1] = 1.0
    mask = np.zeros((1, lanes), np.float32)
    mask[0, :L] = m2.reshape(-1)

    return {
        "mask": jnp.asarray(mask),
        "gn0_gamma": raw["gn0_gamma"].reshape(-1, 1),
        "gn0_beta": raw["gn0_beta"].reshape(-1, 1),
        "blocks": packed_blocks,
        "wd": wd,
        "fc_b": raw["fc_b"].reshape(1, NUM_ACTIONS),
    }


# ----------------------------------------------------------------------------
# Single fused pallas_call for the whole forward pass.
# ----------------------------------------------------------------------------
@functools.partial(jax.jit, static_argnames=("is_policy_gradient",))
def model_forward(x, packed, is_policy_gradient=True):
    B, cin0, H, W = x.shape
    _, _, _, _, lanes, margin = _layout(H)
    blocks = packed["blocks"]
    tap_stride = blocks[0][0].shape[1] // 9
    cmax = max([cin0] + [blk[0].shape[0] for blk in blocks])

    inputs = [x, packed["mask"], packed["gn0_gamma"], packed["gn0_beta"]]
    in_specs = [
        pl.BlockSpec((1, cin0, H, W), lambda b: (b, 0, 0, 0)),
        pl.BlockSpec((1, lanes), lambda b: (0, 0)),
        pl.BlockSpec((cin0, 1), lambda b: (0, 0)),
        pl.BlockSpec((cin0, 1), lambda b: (0, 0)),
    ]
    for (w_mat, bias, gamma, beta) in blocks:
        cout = w_mat.shape[0]
        inputs += [w_mat, bias, gamma, beta]
        in_specs += [
            pl.BlockSpec(w_mat.shape, lambda b: (0, 0)),
            pl.BlockSpec((cout, 1), lambda b: (0, 0)),
            pl.BlockSpec((cout, 1), lambda b: (0, 0)),
            pl.BlockSpec((cout, 1), lambda b: (0, 0)),
        ]
    inputs += [packed["wd"], packed["fc_b"]]
    in_specs += [
        pl.BlockSpec(packed["wd"].shape, lambda b: (0, 0, 0)),
        pl.BlockSpec((1, NUM_ACTIONS), lambda b: (0, 0)),
    ]

    kernel = make_fused_kernel(
        num_blocks=len(blocks), H=H, W=W, lanes=lanes, margin=margin,
        tap_stride=tap_stride, use_softmax=is_policy_gradient)

    out = pl.pallas_call(
        kernel,
        out_shape=jax.ShapeDtypeStruct((B, 1, NUM_ACTIONS), jnp.float32),
        grid_spec=pltpu.PrefetchScalarGridSpec(
            num_scalar_prefetch=0,
            grid=(B,),
            in_specs=in_specs,
            out_specs=pl.BlockSpec((1, 1, NUM_ACTIONS), lambda b: (b, 0, 0)),
            scratch_shapes=[
                pltpu.VMEM((cmax, lanes + 2 * margin), jnp.float32),  # haloed act
                pltpu.VMEM((9 * tap_stride, lanes), jnp.float32),     # im2col
            ]),
        compiler_params=pltpu.CompilerParams(
            dimension_semantics=("parallel",)),
    )(*inputs)
    return out[:, 0, :]


# ----------------------------------------------------------------------------
# Pure-JAX reference (matches the PyTorch module semantics) for validation.
# ----------------------------------------------------------------------------
def reference_forward(x, raw, use_softmax):
    def gn(v, gamma, beta):
        mean = jnp.mean(v, axis=(1, 2, 3), keepdims=True)
        var = jnp.mean(jnp.square(v - mean), axis=(1, 2, 3), keepdims=True)
        vhat = (v - mean) * lax.rsqrt(var + EPS)
        return vhat * gamma[None, :, None, None] + beta[None, :, None, None]

    def gelu(v):
        return 0.5 * v * (1.0 + lax.erf(v * (1.0 / math.sqrt(2.0))))

    h = gn(x, raw["gn0_gamma"], raw["gn0_beta"])
    for (w, b, g, be) in raw["blocks"]:
        h = lax.conv_general_dilated(
            h, w, window_strides=(1, 1), padding="SAME",
            dimension_numbers=("NCHW", "OIHW", "NCHW"),
            precision=lax.Precision.HIGHEST)
        h = gelu(gn(h + b[None, :, None, None], g, be))
    feat = h.reshape(h.shape[0], -1)
    logits = jnp.dot(feat, raw["fc_w"].T,
                     precision=lax.Precision.HIGHEST) + raw["fc_b"][None, :]
    return jax.nn.softmax(logits, axis=-1) if use_softmax else logits


if __name__ == "__main__":
    field_size = 8
    num_layers = 2
    num_frames = 3
    num_channels = 4
    batch = 2
    is_policy_gradient = True   # algorithm == 'policy_gradient' -> Softmax head

    key = jax.random.PRNGKey(0)
    kx, kp = jax.random.split(key)
    x = jax.random.normal(kx, (batch, num_frames, field_size, field_size),
                          jnp.float32)
    raw_params = init_params(kp, field_size, num_layers, num_frames, num_channels)
    packed = pack_params(raw_params, field_size)

    out = model_forward(x, packed, is_policy_gradient=is_policy_gradient)
    out = jax.block_until_ready(out)

    assert out.shape == (batch, NUM_ACTIONS), out.shape
    # Softmax rows must sum to 1.
    row_sums = jnp.sum(out, axis=-1)
    assert jnp.allclose(row_sums, jnp.ones_like(row_sums), atol=1e-4), row_sums
    # Cross-check against a pure-JAX reference (loose tol covers MXU precision).
    ref = reference_forward(x, raw_params, is_policy_gradient)
    assert jnp.allclose(out, ref, atol=2e-2), (out, ref)
    print("KERNEL_OK")
</pallas_src>

<mosaic_0001>
module attributes {stable_mosaic.version = 11 : i64} {
  func.func @kernel(%arg0: i32, %arg1: memref<1x3x8x8xf32, #tpu.memory_space<vmem>>, %arg2: memref<1x128xf32, #tpu.memory_space<vmem>>, %arg3: memref<3x1xf32, #tpu.memory_space<vmem>>, %arg4: memref<3x1xf32, #tpu.memory_space<vmem>>, %arg5: memref<4x72xf32, #tpu.memory_space<vmem>>, %arg6: memref<4x1xf32, #tpu.memory_space<vmem>>, %arg7: memref<4x1xf32, #tpu.memory_space<vmem>>, %arg8: memref<4x1xf32, #tpu.memory_space<vmem>>, %arg9: memref<4x72xf32, #tpu.memory_space<vmem>>, %arg10: memref<4x1xf32, #tpu.memory_space<vmem>>, %arg11: memref<4x1xf32, #tpu.memory_space<vmem>>, %arg12: memref<4x1xf32, #tpu.memory_space<vmem>>, %arg13: memref<4x72xf32, #tpu.memory_space<vmem>>, %arg14: memref<4x1xf32, #tpu.memory_space<vmem>>, %arg15: memref<4x1xf32, #tpu.memory_space<vmem>>, %arg16: memref<4x1xf32, #tpu.memory_space<vmem>>, %arg17: memref<4x4x128xf32, #tpu.memory_space<vmem>>, %arg18: memref<1x4xf32, #tpu.memory_space<vmem>>, %arg19: memref<1x1x4xf32, #tpu.memory_space<vmem>>, %arg20: memref<4x160xf32, #tpu.memory_space<vmem>>, %arg21: memref<72x128xf32, #tpu.memory_space<vmem>>) attributes {dimension_semantics = [#tpu.dimension_semantics<parallel>], iteration_bounds = array<i64: 2>, scalar_prefetch = 0 : i64, scratch_operands = 2 : i64, tpu.core_type = #tpu.core_type<tc>, window_params = [{transform_indices = @transform_0, window_bounds = array<i64: 1, 3, 8, 8>}, {pipeline_mode = #tpu.pipeline_mode<synchronous>, transform_indices = @transform_1, window_bounds = array<i64: 1, 128>}, {pipeline_mode = #tpu.pipeline_mode<synchronous>, transform_indices = @transform_2, window_bounds = array<i64: 3, 1>}, {pipeline_mode = #tpu.pipeline_mode<synchronous>, transform_indices = @transform_3, window_bounds = array<i64: 3, 1>}, {pipeline_mode = #tpu.pipeline_mode<synchronous>, transform_indices = @transform_4, window_bounds = array<i64: 4, 72>}, {pipeline_mode = #tpu.pipeline_mode<synchronous>, transform_indices = @transform_5, window_bounds = array<i64: 4, 1>}, {pipeline_mode = #tpu.pipeline_mode<synchronous>, transform_indices = @transform_6, window_bounds = array<i64: 4, 1>}, {pipeline_mode = #tpu.pipeline_mode<synchronous>, transform_indices = @transform_7, window_bounds = array<i64: 4, 1>}, {pipeline_mode = #tpu.pipeline_mode<synchronous>, transform_indices = @transform_8, window_bounds = array<i64: 4, 72>}, {pipeline_mode = #tpu.pipeline_mode<synchronous>, transform_indices = @transform_9, window_bounds = array<i64: 4, 1>}, {pipeline_mode = #tpu.pipeline_mode<synchronous>, transform_indices = @transform_10, window_bounds = array<i64: 4, 1>}, {pipeline_mode = #tpu.pipeline_mode<synchronous>, transform_indices = @transform_11, window_bounds = array<i64: 4, 1>}, {pipeline_mode = #tpu.pipeline_mode<synchronous>, transform_indices = @transform_12, window_bounds = array<i64: 4, 72>}, {pipeline_mode = #tpu.pipeline_mode<synchronous>, transform_indices = @transform_13, window_bounds = array<i64: 4, 1>}, {pipeline_mode = #tpu.pipeline_mode<synchronous>, transform_indices = @transform_14, window_bounds = array<i64: 4, 1>}, {pipeline_mode = #tpu.pipeline_mode<synchronous>, transform_indices = @transform_15, window_bounds = array<i64: 4, 1>}, {pipeline_mode = #tpu.pipeline_mode<synchronous>, transform_indices = @transform_16, window_bounds = array<i64: 4, 4, 128>}, {pipeline_mode = #tpu.pipeline_mode<synchronous>, transform_indices = @transform_17, window_bounds = array<i64: 1, 4>}, {transform_indices = @transform_18, window_bounds = array<i64: 1, 1, 4>}]} {
    %c0 = arith.constant 0 : index
    %c0_0 = arith.constant 0 : index
    %0 = vector.load %arg2[%c0, %c0_0] : memref<1x128xf32, #tpu.memory_space<vmem>>, vector<1x128xf32>
    %cst = arith.constant 0.000000e+00 : f32
    %1 = vector.broadcast %cst : f32 to vector<4x160xf32>
    %c0_1 = arith.constant 0 : index
    %c0_2 = arith.constant 0 : index
    %2 = vector.load %arg20[%c0_1, %c0_2] : memref<4x160xf32, #tpu.memory_space<vmem>>, vector<4x160xf32>
    tpu.vector_store %arg20[%c0_1, %c0_2], %1 {strides = array<i32>} : memref<4x160xf32, #tpu.memory_space<vmem>>, vector<4x160xf32>,
    %cst_3 = arith.constant 0.000000e+00 : f32
    %3 = vector.broadcast %cst_3 : f32 to vector<72x128xf32>
    %c0_4 = arith.constant 0 : index
    %c0_5 = arith.constant 0 : index
    %4 = vector.load %arg21[%c0_4, %c0_5] : memref<72x128xf32, #tpu.memory_space<vmem>>, vector<72x128xf32>
    tpu.vector_store %arg21[%c0_4, %c0_5], %3 {strides = array<i32>} : memref<72x128xf32, #tpu.memory_space<vmem>>, vector<72x128xf32>,
    %c0_6 = arith.constant 0 : index
    %c0_7 = arith.constant 0 : index
    %c0_8 = arith.constant 0 : index
    %c0_9 = arith.constant 0 : index
    %5 = vector.load %arg1[%c0_6, %c0_7, %c0_8, %c0_9] : memref<1x3x8x8xf32, #tpu.memory_space<vmem>>, vector<1x1x1x8xf32>
    %6 = vector.shape_cast %5 : vector<1x1x1x8xf32> to vector<1x8xf32>
    %c0_10 = arith.constant 0 : index
    %c27 = arith.constant 27 : index
    %7 = vector.load %arg20[%c0_10, %c27] : memref<4x160xf32, #tpu.memory_space<vmem>>, vector<1x8xf32>
    tpu.vector_store %arg20[%c0_10, %c27], %6 {strides = array<i32>} : memref<4x160xf32, #tpu.memory_space<vmem>>, vector<1x8xf32>,
    %c0_11 = arith.constant 0 : index
    %c0_12 = arith.constant 0 : index
    %c1 = arith.constant 1 : index
    %c0_13 = arith.constant 0 : index
    %8 = vector.load %arg1[%c0_11, %c0_12, %c1, %c0_13] : memref<1x3x8x8xf32, #tpu.memory_space<vmem>>, vector<1x1x1x8xf32>
    %9 = vector.shape_cast %8 : vector<1x1x1x8xf32> to vector<1x8xf32>
    %c0_14 = arith.constant 0 : index
    %c37 = arith.constant 37 : index
    %10 = vector.load %arg20[%c0_14, %c37] : memref<4x160xf32, #tpu.memory_space<vmem>>, vector<1x8xf32>
    tpu.vector_store %arg20[%c0_14, %c37], %9 {strides = array<i32>} : memref<4x160xf32, #tpu.memory_space<vmem>>, vector<1x8xf32>,
    %c0_15 = arith.constant 0 : index
    %c0_16 = arith.constant 0 : index
    %c2 = arith.constant 2 : index
    %c0_17 = arith.constant 0 : index
    %11 = vector.load %arg1[%c0_15, %c0_16, %c2, %c0_17] : memref<1x3x8x8xf32, #tpu.memory_space<vmem>>, vector<1x1x1x8xf32>
    %12 = vector.shape_cast %11 : vector<1x1x1x8xf32> to vector<1x8xf32>
    %c0_18 = arith.constant 0 : index
    %c47 = arith.constant 47 : index
    %13 = vector.load %arg20[%c0_18, %c47] : memref<4x160xf32, #tpu.memory_space<vmem>>, vector<1x8xf32>
    tpu.vector_store %arg20[%c0_18, %c47], %12 {strides = array<i32>} : memref<4x160xf32, #tpu.memory_space<vmem>>, vector<1x8xf32>,
    %c0_19 = arith.constant 0 : index
    %c0_20 = arith.constant 0 : index
    %c3 = arith.constant 3 : index
    %c0_21 = arith.constant 0 : index
    %14 = vector.load %arg1[%c0_19, %c0_20, %c3, %c0_21] : memref<1x3x8x8xf32, #tpu.memory_space<vmem>>, vector<1x1x1x8xf32>
    %15 = vector.shape_cast %14 : vector<1x1x1x8xf32> to vector<1x8xf32>
    %c0_22 = arith.constant 0 : index
    %c57 = arith.constant 57 : index
    %16 = vector.load %arg20[%c0_22, %c57] : memref<4x160xf32, #tpu.memory_space<vmem>>, vector<1x8xf32>
    tpu.vector_store %arg20[%c0_22, %c57], %15 {strides = array<i32>} : memref<4x160xf32, #tpu.memory_space<vmem>>, vector<1x8xf32>,
    %c0_23 = arith.constant 0 : index
    %c0_24 = arith.constant 0 : index
    %c4 = arith.constant 4 : index
    %c0_25 = arith.constant 0 : index
    %17 = vector.load %arg1[%c0_23, %c0_24, %c4, %c0_25] : memref<1x3x8x8xf32, #tpu.memory_space<vmem>>, vector<1x1x1x8xf32>
    %18 = vector.shape_cast %17 : vector<1x1x1x8xf32> to vector<1x8xf32>
    %c0_26 = arith.constant 0 : index
    %c67 = arith.constant 67 : index
    %19 = vector.load %arg20[%c0_26, %c67] : memref<4x160xf32, #tpu.memory_space<vmem>>, vector<1x8xf32>
    tpu.vector_store %arg20[%c0_26, %c67], %18 {strides = array<i32>} : memref<4x160xf32, #tpu.memory_space<vmem>>, vector<1x8xf32>,
    %c0_27 = arith.constant 0 : index
    %c0_28 = arith.constant 0 : index
    %c5 = arith.constant 5 : index
    %c0_29 = arith.constant 0 : index
    %20 = vector.load %arg1[%c0_27, %c0_28, %c5, %c0_29] : memref<1x3x8x8xf32, #tpu.memory_space<vmem>>, vector<1x1x1x8xf32>
    %21 = vector.shape_cast %20 : vector<1x1x1x8xf32> to vector<1x8xf32>
    %c0_30 = arith.constant 0 : index
    %c77 = arith.constant 77 : index
    %22 = vector.load %arg20[%c0_30, %c77] : memref<4x160xf32, #tpu.memory_space<vmem>>, vector<1x8xf32>
    tpu.vector_store %arg20[%c0_30, %c77], %21 {strides = array<i32>} : memref<4x160xf32, #tpu.memory_space<vmem>>, vector<1x8xf32>,
    %c0_31 = arith.constant 0 : index
    %c0_32 = arith.constant 0 : index
    %c6 = arith.constant 6 : index
    %c0_33 = arith.constant 0 : index
    %23 = vector.load %arg1[%c0_31, %c0_32, %c6, %c0_33] : memref<1x3x8x8xf32, #tpu.memory_space<vmem>>, vector<1x1x1x8xf32>
    %24 = vector.shape_cast %23 : vector<1x1x1x8xf32> to vector<1x8xf32>
    %c0_34 = arith.constant 0 : index
    %c87 = arith.constant 87 : index
    %25 = vector.load %arg20[%c0_34, %c87] : memref<4x160xf32, #tpu.memory_space<vmem>>, vector<1x8xf32>
    tpu.vector_store %arg20[%c0_34, %c87], %24 {strides = array<i32>} : memref<4x160xf32, #tpu.memory_space<vmem>>, vector<1x8xf32>,
    %c0_35 = arith.constant 0 : index
    %c0_36 = arith.constant 0 : index
    %c7 = arith.constant 7 : index
    %c0_37 = arith.constant 0 : index
    %26 = vector.load %arg1[%c0_35, %c0_36, %c7, %c0_37] : memref<1x3x8x8xf32, #tpu.memory_space<vmem>>, vector<1x1x1x8xf32>
    %27 = vector.shape_cast %26 : vector<1x1x1x8xf32> to vector<1x8xf32>
    %c0_38 = arith.constant 0 : index
    %c97 = arith.constant 97 : index
    %28 = vector.load %arg20[%c0_38, %c97] : memref<4x160xf32, #tpu.memory_space<vmem>>, vector<1x8xf32>
    tpu.vector_store %arg20[%c0_38, %c97], %27 {strides = array<i32>} : memref<4x160xf32, #tpu.memory_space<vmem>>, vector<1x8xf32>,
    %c0_39 = arith.constant 0 : index
    %c1_40 = arith.constant 1 : index
    %c0_41 = arith.constant 0 : index
    %c0_42 = arith.constant 0 : index
    %29 = vector.load %arg1[%c0_39, %c1_40, %c0_41, %c0_42] : memref<1x3x8x8xf32, #tpu.memory_space<vmem>>, vector<1x1x1x8xf32>
    %30 = vector.shape_cast %29 : vector<1x1x1x8xf32> to vector<1x8xf32>
    %c1_43 = arith.constant 1 : index
    %c27_44 = arith.constant 27 : index
    %31 = vector.load %arg20[%c1_43, %c27_44] : memref<4x160xf32, #tpu.memory_space<vmem>>, vector<1x8xf32>
    tpu.vector_store %arg20[%c1_43, %c27_44], %30 {strides = array<i32>} : memref<4x160xf32, #tpu.memory_space<vmem>>, vector<1x8xf32>,
    %c0_45 = arith.constant 0 : index
    %c1_46 = arith.constant 1 : index
    %c1_47 = arith.constant 1 : index
    %c0_48 = arith.constant 0 : index
    %32 = vector.load %arg1[%c0_45, %c1_46, %c1_47, %c0_48] : memref<1x3x8x8xf32, #tpu.memory_space<vmem>>, vector<1x1x1x8xf32>
    %33 = vector.shape_cast %32 : vector<1x1x1x8xf32> to vector<1x8xf32>
    %c1_49 = arith.constant 1 : index
    %c37_50 = arith.constant 37 : index
    %34 = vector.load %arg20[%c1_49, %c37_50] : memref<4x160xf32, #tpu.memory_space<vmem>>, vector<1x8xf32>
    tpu.vector_store %arg20[%c1_49, %c37_50], %33 {strides = array<i32>} : memref<4x160xf32, #tpu.memory_space<vmem>>, vector<1x8xf32>,
    %c0_51 = arith.constant 0 : index
    %c1_52 = arith.constant 1 : index
    %c2_53 = arith.constant 2 : index
    %c0_54 = arith.constant 0 : index
    %35 = vector.load %arg1[%c0_51, %c1_52, %c2_53, %c0_54] : memref<1x3x8x8xf32, #tpu.memory_space<vmem>>, vector<1x1x1x8xf32>
    %36 = vector.shape_cast %35 : vector<1x1x1x8xf32> to vector<1x8xf32>
    %c1_55 = arith.constant 1 : index
    %c47_56 = arith.constant 47 : index
    %37 = vector.load %arg20[%c1_55, %c47_56] : memref<4x160xf32, #tpu.memory_space<vmem>>, vector<1x8xf32>
    tpu.vector_store %arg20[%c1_55, %c47_56], %36 {strides = array<i32>} : memref<4x160xf32, #tpu.memory_space<vmem>>, vector<1x8xf32>,
    %c0_57 = arith.constant 0 : index
    %c1_58 = arith.constant 1 : index
    %c3_59 = arith.constant 3 : index
    %c0_60 = arith.constant 0 : index
    %38 = vector.load %arg1[%c0_57, %c1_58, %c3_59, %c0_60] : memref<1x3x8x8xf32, #tpu.memory_space<vmem>>, vector<1x1x1x8xf32>
    %39 = vector.shape_cast %38 : vector<1x1x1x8xf32> to vector<1x8xf32>
    %c1_61 = arith.constant 1 : index
    %c57_62 = arith.constant 57 : index
    %40 = vector.load %arg20[%c1_61, %c57_62] : memref<4x160xf32, #tpu.memory_space<vmem>>, vector<1x8xf32>
    tpu.vector_store %arg20[%c1_61, %c57_62], %39 {strides = array<i32>} : memref<4x160xf32, #tpu.memory_space<vmem>>, vector<1x8xf32>,
    %c0_63 = arith.constant 0 : index
    %c1_64 = arith.constant 1 : index
    %c4_65 = arith.constant 4 : index
    %c0_66 = arith.constant 0 : index
    %41 = vector.load %arg1[%c0_63, %c1_64, %c4_65, %c0_66] : memref<1x3x8x8xf32, #tpu.memory_space<vmem>>, vector<1x1x1x8xf32>
    %42 = vector.shape_cast %41 : vector<1x1x1x8xf32> to vector<1x8xf32>
    %c1_67 = arith.constant 1 : index
    %c67_68 = arith.constant 67 : index
    %43 = vector.load %arg20[%c1_67, %c67_68] : memref<4x160xf32, #tpu.memory_space<vmem>>, vector<1x8xf32>
    tpu.vector_store %arg20[%c1_67, %c67_68], %42 {strides = array<i32>} : memref<4x160xf32, #tpu.memory_space<vmem>>, vector<1x8xf32>,
    %c0_69 = arith.constant 0 : index
    %c1_70 = arith.constant 1 : index
    %c5_71 = arith.constant 5 : index
    %c0_72 = arith.constant 0 : index
    %44 = vector.load %arg1[%c0_69, %c1_70, %c5_71, %c0_72] : memref<1x3x8x8xf32, #tpu.memory_space<vmem>>, vector<1x1x1x8xf32>
    %45 = vector.shape_cast %44 : vector<1x1x1x8xf32> to vector<1x8xf32>
    %c1_73 = arith.constant 1 : index
    %c77_74 = arith.constant 77 : index
    %46 = vector.load %arg20[%c1_73, %c77_74] : memref<4x160xf32, #tpu.memory_space<vmem>>, vector<1x8xf32>
    tpu.vector_store %arg20[%c1_73, %c77_74], %45 {strides = array<i32>} : memref<4x160xf32, #tpu.memory_space<vmem>>, vector<1x8xf32>,
    %c0_75 = arith.constant 0 : index
    %c1_76 = arith.constant 1 : index
    %c6_77 = arith.constant 6 : index
    %c0_78 = arith.constant 0 : index
    %47 = vector.load %arg1[%c0_75, %c1_76, %c6_77, %c0_78] : memref<1x3x8x8xf32, #tpu.memory_space<vmem>>, vector<1x1x1x8xf32>
    %48 = vector.shape_cast %47 : vector<1x1x1x8xf32> to vector<1x8xf32>
    %c1_79 = arith.constant 1 : index
    %c87_80 = arith.constant 87 : index
    %49 = vector.load %arg20[%c1_79, %c87_80] : memref<4x160xf32, #tpu.memory_space<vmem>>, vector<1x8xf32>
    tpu.vector_store %arg20[%c1_79, %c87_80], %48 {strides = array<i32>} : memref<4x160xf32, #tpu.memory_space<vmem>>, vector<1x8xf32>,
    %c0_81 = arith.constant 0 : index
    %c1_82 = arith.constant 1 : index
    %c7_83 = arith.constant 7 : index
    %c0_84 = arith.constant 0 : index
    %50 = vector.load %arg1[%c0_81, %c1_82, %c7_83, %c0_84] : memref<1x3x8x8xf32, #tpu.memory_space<vmem>>, vector<1x1x1x8xf32>
    %51 = vector.shape_cast %50 : vector<1x1x1x8xf32> to vector<1x8xf32>
    %c1_85 = arith.constant 1 : index
    %c97_86 = arith.constant 97 : index
    %52 = vector.load %arg20[%c1_85, %c97_86] : memref<4x160xf32, #tpu.memory_space<vmem>>, vector<1x8xf32>
    tpu.vector_store %arg20[%c1_85, %c97_86], %51 {strides = array<i32>} : memref<4x160xf32, #tpu.memory_space<vmem>>, vector<1x8xf32>,
    %c0_87 = arith.constant 0 : index
    %c2_88 = arith.constant 2 : index
    %c0_89 = arith.constant 0 : index
    %c0_90 = arith.constant 0 : index
    %53 = vector.load %arg1[%c0_87, %c2_88, %c0_89, %c0_90] : memref<1x3x8x8xf32, #tpu.memory_space<vmem>>, vector<1x1x1x8xf32>
    %54 = vector.shape_cast %53 : vector<1x1x1x8xf32> to vector<1x8xf32>
    %c2_91 = arith.constant 2 : index
    %c27_92 = arith.constant 27 : index
    %55 = vector.load %arg20[%c2_91, %c27_92] : memref<4x160xf32, #tpu.memory_space<vmem>>, vector<1x8xf32>
    tpu.vector_store %arg20[%c2_91, %c27_92], %54 {strides = array<i32>} : memref<4x160xf32, #tpu.memory_space<vmem>>, vector<1x8xf32>,
    %c0_93 = arith.constant 0 : index
    %c2_94 = arith.constant 2 : index
    %c1_95 = arith.constant 1 : index
    %c0_96 = arith.constant 0 : index
    %56 = vector.load %arg1[%c0_93, %c2_94, %c1_95, %c0_96] : memref<1x3x8x8xf32, #tpu.memory_space<vmem>>, vector<1x1x1x8xf32>
    %57 = vector.shape_cast %56 : vector<1x1x1x8xf32> to vector<1x8xf32>
    %c2_97 = arith.constant 2 : index
    %c37_98 = arith.constant 37 : index
    %58 = vector.load %arg20[%c2_97, %c37_98] : memref<4x160xf32, #tpu.memory_space<vmem>>, vector<1x8xf32>
    tpu.vector_store %arg20[%c2_97, %c37_98], %57 {strides = array<i32>} : memref<4x160xf32, #tpu.memory_space<vmem>>, vector<1x8xf32>,
    %c0_99 = arith.constant 0 : index
    %c2_100 = arith.constant 2 : index
    %c2_101 = arith.constant 2 : index
    %c0_102 = arith.constant 0 : index
    %59 = vector.load %arg1[%c0_99, %c2_100, %c2_101, %c0_102] : memref<1x3x8x8xf32, #tpu.memory_space<vmem>>, vector<1x1x1x8xf32>
    %60 = vector.shape_cast %59 : vector<1x1x1x8xf32> to vector<1x8xf32>
    %c2_103 = arith.constant 2 : index
    %c47_104 = arith.constant 47 : index
    %61 = vector.load %arg20[%c2_103, %c47_104] : memref<4x160xf32, #tpu.memory_space<vmem>>, vector<1x8xf32>
    tpu.vector_store %arg20[%c2_103, %c47_104], %60 {strides = array<i32>} : memref<4x160xf32, #tpu.memory_space<vmem>>, vector<1x8xf32>,
    %c0_105 = arith.constant 0 : index
    %c2_106 = arith.constant 2 : index
    %c3_107 = arith.constant 3 : index
    %c0_108 = arith.constant 0 : index
    %62 = vector.load %arg1[%c0_105, %c2_106, %c3_107, %c0_108] : memref<1x3x8x8xf32, #tpu.memory_space<vmem>>, vector<1x1x1x8xf32>
    %63 = vector.shape_cast %62 : vector<1x1x1x8xf32> to vector<1x8xf32>
    %c2_109 = arith.constant 2 : index
    %c57_110 = arith.constant 57 : index
    %64 = vector.load %arg20[%c2_109, %c57_110] : memref<4x160xf32, #tpu.memory_space<vmem>>, vector<1x8xf32>
    tpu.vector_store %arg20[%c2_109, %c57_110], %63 {strides = array<i32>} : memref<4x160xf32, #tpu.memory_space<vmem>>, vector<1x8xf32>,
    %c0_111 = arith.constant 0 : index
    %c2_112 = arith.constant 2 : index
    %c4_113 = arith.constant 4 : index
    %c0_114 = arith.constant 0 : index
    %65 = vector.load %arg1[%c0_111, %c2_112, %c4_113, %c0_114] : memref<1x3x8x8xf32, #tpu.memory_space<vmem>>, vector<1x1x1x8xf32>
    %66 = vector.shape_cast %65 : vector<1x1x1x8xf32> to vector<1x8xf32>
    %c2_115 = arith.constant 2 : index
    %c67_116 = arith.constant 67 : index
    %67 = vector.load %arg20[%c2_115, %c67_116] : memref<4x160xf32, #tpu.memory_space<vmem>>, vector<1x8xf32>
    tpu.vector_store %arg20[%c2_115, %c67_116], %66 {strides = array<i32>} : memref<4x160xf32, #tpu.memory_space<vmem>>, vector<1x8xf32>,
    %c0_117 = arith.constant 0 : index
    %c2_118 = arith.constant 2 : index
    %c5_119 = arith.constant 5 : index
    %c0_120 = arith.constant 0 : index
    %68 = vector.load %arg1[%c0_117, %c2_118, %c5_119, %c0_120] : memref<1x3x8x8xf32, #tpu.memory_space<vmem>>, vector<1x1x1x8xf32>
    %69 = vector.shape_cast %68 : vector<1x1x1x8xf32> to vector<1x8xf32>
    %c2_121 = arith.constant 2 : index
    %c77_122 = arith.constant 77 : index
    %70 = vector.load %arg20[%c2_121, %c77_122] : memref<4x160xf32, #tpu.memory_space<vmem>>, vector<1x8xf32>
    tpu.vector_store %arg20[%c2_121, %c77_122], %69 {strides = array<i32>} : memref<4x160xf32, #tpu.memory_space<vmem>>, vector<1x8xf32>,
    %c0_123 = arith.constant 0 : index
    %c2_124 = arith.constant 2 : index
    %c6_125 = arith.constant 6 : index
    %c0_126 = arith.constant 0 : index
    %71 = vector.load %arg1[%c0_123, %c2_124, %c6_125, %c0_126] : memref<1x3x8x8xf32, #tpu.memory_space<vmem>>, vector<1x1x1x8xf32>
    %72 = vector.shape_cast %71 : vector<1x1x1x8xf32> to vector<1x8xf32>
    %c2_127 = arith.constant 2 : index
    %c87_128 = arith.constant 87 : index
    %73 = vector.load %arg20[%c2_127, %c87_128] : memref<4x160xf32, #tpu.memory_space<vmem>>, vector<1x8xf32>
    tpu.vector_store %arg20[%c2_127, %c87_128], %72 {strides = array<i32>} : memref<4x160xf32, #tpu.memory_space<vmem>>, vector<1x8xf32>,
    %c0_129 = arith.constant 0 : index
    %c2_130 = arith.constant 2 : index
    %c7_131 = arith.constant 7 : index
    %c0_132 = arith.constant 0 : index
    %74 = vector.load %arg1[%c0_129, %c2_130, %c7_131, %c0_132] : memref<1x3x8x8xf32, #tpu.memory_space<vmem>>, vector<1x1x1x8xf32>
    %75 = vector.shape_cast %74 : vector<1x1x1x8xf32> to vector<1x8xf32>
    %c2_133 = arith.constant 2 : index
    %c97_134 = arith.constant 97 : index
    %76 = vector.load %arg20[%c2_133, %c97_134] : memref<4x160xf32, #tpu.memory_space<vmem>>, vector<1x8xf32>
    tpu.vector_store %arg20[%c2_133, %c97_134], %75 {strides = array<i32>} : memref<4x160xf32, #tpu.memory_space<vmem>>, vector<1x8xf32>,
    %c0_135 = arith.constant 0 : index
    %c16 = arith.constant 16 : index
    %77 = vector.load %arg20[%c0_135, %c16] : memref<4x160xf32, #tpu.memory_space<vmem>>, vector<3x128xf32>
    %c0_136 = arith.constant 0 : index
    %c0_137 = arith.constant 0 : index
    %78 = vector.load %arg3[%c0_136, %c0_137] : memref<3x1xf32, #tpu.memory_space<vmem>>, vector<3x1xf32>
    %c0_138 = arith.constant 0 : index
    %c0_139 = arith.constant 0 : index
    %79 = vector.load %arg4[%c0_138, %c0_139] : memref<3x1xf32, #tpu.memory_space<vmem>>, vector<3x1xf32>
    %80 = vector.shape_cast %77 : vector<3x128xf32> to vector<1x3x128xf32>
    %cst_140 = arith.constant dense<0.000000e+00> : vector<1xf32>
    %81 = vector.multi_reduction <add>, %80, %cst_140 [1, 2] : vector<1x3x128xf32> to vector<1xf32>
    %82 = vector.shape_cast %81 : vector<1xf32> to vector<1x1x1xf32>
    %83 = vector.extract %82[0, 0, 0] : f32 from vector<1x1x1xf32>
    %84 = arith.mulf %77, %77 : vector<3x128xf32>
    %85 = vector.shape_cast %84 : vector<3x128xf32> to vector<1x3x128xf32>
    %cst_141 = arith.constant dense<0.000000e+00> : vector<1xf32>
    %86 = vector.multi_reduction <add>, %85, %cst_141 [1, 2] : vector<1x3x128xf32> to vector<1xf32>
    %87 = vector.shape_cast %86 : vector<1xf32> to vector<1x1x1xf32>
    %88 = vector.extract %87[0, 0, 0] : f32 from vector<1x1x1xf32>
    %cst_142 = arith.constant 1.920000e+02 : f32
    %89 = arith.divf %83, %cst_142 : f32
    %cst_143 = arith.constant 1.920000e+02 : f32
    %90 = arith.divf %88, %cst_143 : f32
    %91 = arith.mulf %89, %89 : f32
    %92 = arith.subf %90, %91 : f32
    %cst_144 = arith.constant 9.99999974E-6 : f32
    %93 = arith.addf %92, %cst_144 : f32
    %94 = math.rsqrt %93 : f32
    %95 = vector.broadcast %89 : f32 to vector<3x128xf32>
    %96 = arith.subf %77, %95 : vector<3x128xf32>
    %97 = vector.broadcast %94 : f32 to vector<3x128xf32>
    %98 = arith.mulf %96, %97 : vector<3x128xf32>
    %99 = vector.broadcast %78 : vector<3x1xf32> to vector<3x128xf32>
    %100 = arith.mulf %98, %99 : vector<3x128xf32>
    %101 = vector.broadcast %79 : vector<3x1xf32> to vector<3x128xf32>
    %102 = arith.addf %100, %101 : vector<3x128xf32>
    %103 = vector.broadcast %0 : vector<1x128xf32> to vector<3x128xf32>
    %104 = arith.mulf %102, %103 : vector<3x128xf32>
    %c0_145 = arith.constant 0 : index
    %c16_146 = arith.constant 16 : index
    %105 = vector.load %arg20[%c0_145, %c16_146] : memref<4x160xf32, #tpu.memory_space<vmem>>, vector<3x128xf32>
    tpu.vector_store %arg20[%c0_145, %c16_146], %104 {strides = array<i32>} : memref<4x160xf32, #tpu.memory_space<vmem>>, vector<3x128xf32>,
    %c0_147 = arith.constant 0 : index
    %c5_148 = arith.constant 5 : index
    %106 = vector.load %arg20[%c0_147, %c5_148] : memref<4x160xf32, #tpu.memory_space<vmem>>, vector<3x128xf32>
    %c0_149 = arith.constant 0 : index
    %c0_150 = arith.constant 0 : index
    %107 = vector.load %arg21[%c0_149, %c0_150] : memref<72x128xf32, #tpu.memory_space<vmem>>, vector<3x128xf32>
    tpu.vector_store %arg21[%c0_149, %c0_150], %106 {strides = array<i32>} : memref<72x128xf32, #tpu.memory_space<vmem>>, vector<3x128xf32>,
    %c0_151 = arith.constant 0 : index
    %c6_152 = arith.constant 6 : index
    %108 = vector.load %arg20[%c0_151, %c6_152] : memref<4x160xf32, #tpu.memory_space<vmem>>, vector<3x128xf32>
    %c8 = arith.constant 8 : index
    %c0_153 = arith.constant 0 : index
    %109 = vector.load %arg21[%c8, %c0_153] : memref<72x128xf32, #tpu.memory_space<vmem>>, vector<3x128xf32>
    tpu.vector_store %arg21[%c8, %c0_153], %108 {strides = array<i32>} : memref<72x128xf32, #tpu.memory_space<vmem>>, vector<3x128xf32>,
    %c0_154 = arith.constant 0 : index
    %c7_155 = arith.constant 7 : index
    %110 = vector.load %arg20[%c0_154, %c7_155] : memref<4x160xf32, #tpu.memory_space<vmem>>, vector<3x128xf32>
    %c16_156 = arith.constant 16 : index
    %c0_157 = arith.constant 0 : index
    %111 = vector.load %arg21[%c16_156, %c0_157] : memref<72x128xf32, #tpu.memory_space<vmem>>, vector<3x128xf32>
    tpu.vector_store %arg21[%c16_156, %c0_157], %110 {strides = array<i32>} : memref<72x128xf32, #tpu.memory_space<vmem>>, vector<3x128xf32>,
    %c0_158 = arith.constant 0 : index
    %c15 = arith.constant 15 : index
    %112 = vector.load %arg20[%c0_158, %c15] : memref<4x160xf32, #tpu.memory_space<vmem>>, vector<3x128xf32>
    %c24 = arith.constant 24 : index
    %c0_159 = arith.constant 0 : index
    %113 = vector.load %arg21[%c24, %c0_159] : memref<72x128xf32, #tpu.memory_space<vmem>>, vector<3x128xf32>
    tpu.vector_store %arg21[%c24, %c0_159], %112 {strides = array<i32>} : memref<72x128xf32, #tpu.memory_space<vmem>>, vector<3x128xf32>,
    %c0_160 = arith.constant 0 : index
    %c16_161 = arith.constant 16 : index
    %114 = vector.load %arg20[%c0_160, %c16_161] : memref<4x160xf32, #tpu.memory_space<vmem>>, vector<3x128xf32>
    %c32 = arith.constant 32 : index
    %c0_162 = arith.constant 0 : index
    %115 = vector.load %arg21[%c32, %c0_162] : memref<72x128xf32, #tpu.memory_space<vmem>>, vector<3x128xf32>
    tpu.vector_store %arg21[%c32, %c0_162], %114 {strides = array<i32>} : memref<72x128xf32, #tpu.memory_space<vmem>>, vector<3x128xf32>,
    %c0_163 = arith.constant 0 : index
    %c17 = arith.constant 17 : index
    %116 = vector.load %arg20[%c0_163, %c17] : memref<4x160xf32, #tpu.memory_space<vmem>>, vector<3x128xf32>
    %c40 = arith.constant 40 : index
    %c0_164 = arith.constant 0 : index
    %117 = vector.load %arg21[%c40, %c0_164] : memref<72x128xf32, #tpu.memory_space<vmem>>, vector<3x128xf32>
    tpu.vector_store %arg21[%c40, %c0_164], %116 {strides = array<i32>} : memref<72x128xf32, #tpu.memory_space<vmem>>, vector<3x128xf32>,
    %c0_165 = arith.constant 0 : index
    %c25 = arith.constant 25 : index
    %118 = vector.load %arg20[%c0_165, %c25] : memref<4x160xf32, #tpu.memory_space<vmem>>, vector<3x128xf32>
    %c48 = arith.constant 48 : index
    %c0_166 = arith.constant 0 : index
    %119 = vector.load %arg21[%c48, %c0_166] : memref<72x128xf32, #tpu.memory_space<vmem>>, vector<3x128xf32>
    tpu.vector_store %arg21[%c48, %c0_166], %118 {strides = array<i32>} : memref<72x128xf32, #tpu.memory_space<vmem>>, vector<3x128xf32>,
    %c0_167 = arith.constant 0 : index
    %c26 = arith.constant 26 : index
    %120 = vector.load %arg20[%c0_167, %c26] : memref<4x160xf32, #tpu.memory_space<vmem>>, vector<3x128xf32>
    %c56 = arith.constant 56 : index
    %c0_168 = arith.constant 0 : index
    %121 = vector.load %arg21[%c56, %c0_168] : memref<72x128xf32, #tpu.memory_space<vmem>>, vector<3x128xf32>
    tpu.vector_store %arg21[%c56, %c0_168], %120 {strides = array<i32>} : memref<72x128xf32, #tpu.memory_space<vmem>>, vector<3x128xf32>,
    %c0_169 = arith.constant 0 : index
    %c27_170 = arith.constant 27 : index
    %122 = vector.load %arg20[%c0_169, %c27_170] : memref<4x160xf32, #tpu.memory_space<vmem>>, vector<3x128xf32>
    %c64 = arith.constant 64 : index
    %c0_171 = arith.constant 0 : index
    %123 = vector.load %arg21[%c64, %c0_171] : memref<72x128xf32, #tpu.memory_space<vmem>>, vector<3x128xf32>
    tpu.vector_store %arg21[%c64, %c0_171], %122 {strides = array<i32>} : memref<72x128xf32, #tpu.memory_space<vmem>>, vector<3x128xf32>,
    %c0_172 = arith.constant 0 : index
    %c0_173 = arith.constant 0 : index
    %124 = vector.load %arg5[%c0_172, %c0_173] : memref<4x72xf32, #tpu.memory_space<vmem>>, vector<4x72xf32>
    %c0_174 = arith.constant 0 : index
    %c0_175 = arith.constant 0 : index
    %125 = vector.load %arg21[%c0_174, %c0_175] : memref<72x128xf32, #tpu.memory_space<vmem>>, vector<72x128xf32>
    %cst_176 = arith.constant dense<0.000000e+00> : vector<4x128xf32>
    %126 = tpu.matmul %124, %125, %cst_176 {dimension_numbers = #tpu.dot_dimension_numbers<[1], [0], [0], [1], [0, 0, 1, 1], [], []>} : vector<4x72xf32>, vector<72x128xf32>, vector<4x128xf32> -> vector<4x128xf32>
    %c0_177 = arith.constant 0 : index
    %c0_178 = arith.constant 0 : index
    %127 = vector.load %arg6[%c0_177, %c0_178] : memref<4x1xf32, #tpu.memory_space<vmem>>, vector<4x1xf32>
    %128 = vector.broadcast %127 : vector<4x1xf32> to vector<4x128xf32>
    %129 = arith.addf %126, %128 : vector<4x128xf32>
    %130 = vector.broadcast %0 : vector<1x128xf32> to vector<4x128xf32>
    %131 = arith.mulf %129, %130 : vector<4x128xf32>
    %c0_179 = arith.constant 0 : index
    %c0_180 = arith.constant 0 : index
    %132 = vector.load %arg7[%c0_179, %c0_180] : memref<4x1xf32, #tpu.memory_space<vmem>>, vector<4x1xf32>
    %c0_181 = arith.constant 0 : index
    %c0_182 = arith.constant 0 : index
    %133 = vector.load %arg8[%c0_181, %c0_182] : memref<4x1xf32, #tpu.memory_space<vmem>>, vector<4x1xf32>
    %134 = vector.shape_cast %131 : vector<4x128xf32> to vector<1x4x128xf32>
    %cst_183 = arith.constant dense<0.000000e+00> : vector<1xf32>
    %135 = vector.multi_reduction <add>, %134, %cst_183 [1, 2] : vector<1x4x128xf32> to vector<1xf32>
    %136 = vector.shape_cast %135 : vector<1xf32> to vector<1x1x1xf32>
    %137 = vector.extract %136[0, 0, 0] : f32 from vector<1x1x1xf32>
    %138 = arith.mulf %131, %131 : vector<4x128xf32>
    %139 = vector.shape_cast %138 : vector<4x128xf32> to vector<1x4x128xf32>
    %cst_184 = arith.constant dense<0.000000e+00> : vector<1xf32>
    %140 = vector.multi_reduction <add>, %139, %cst_184 [1, 2] : vector<1x4x128xf32> to vector<1xf32>
    %141 = vector.shape_cast %140 : vector<1xf32> to vector<1x1x1xf32>
    %142 = vector.extract %141[0, 0, 0] : f32 from vector<1x1x1xf32>
    %cst_185 = arith.constant 2.560000e+02 : f32
    %143 = arith.divf %137, %cst_185 : f32
    %cst_186 = arith.constant 2.560000e+02 : f32
    %144 = arith.divf %142, %cst_186 : f32
    %145 = arith.mulf %143, %143 : f32
    %146 = arith.subf %144, %145 : f32
    %cst_187 = arith.constant 9.99999974E-6 : f32
    %147 = arith.addf %146, %cst_187 : f32
    %148 = math.rsqrt %147 : f32
    %149 = vector.broadcast %143 : f32 to vector<4x128xf32>
    %150 = arith.subf %131, %149 : vector<4x128xf32>
    %151 = vector.broadcast %148 : f32 to vector<4x128xf32>
    %152 = arith.mulf %150, %151 : vector<4x128xf32>
    %153 = vector.broadcast %132 : vector<4x1xf32> to vector<4x128xf32>
    %154 = arith.mulf %152, %153 : vector<4x128xf32>
    %155 = vector.broadcast %133 : vector<4x1xf32> to vector<4x128xf32>
    %156 = arith.addf %154, %155 : vector<4x128xf32>
    %cst_188 = arith.constant 5.000000e-01 : f32
    %157 = vector.broadcast %cst_188 : f32 to vector<4x128xf32>
    %158 = arith.mulf %157, %156 : vector<4x128xf32>
    %cst_189 = arith.constant 0.707106769 : f32
    %159 = vector.broadcast %cst_189 : f32 to vector<4x128xf32>
    %160 = arith.mulf %156, %159 : vector<4x128xf32>
    %161 = math.erf %160 : vector<4x128xf32>
    %cst_190 = arith.constant 1.000000e+00 : f32
    %162 = vector.broadcast %cst_190 : f32 to vector<4x128xf32>
    %163 = arith.addf %162, %161 : vector<4x128xf32>
    %164 = arith.mulf %158, %163 : vector<4x128xf32>
    %165 = vector.broadcast %0 : vector<1x128xf32> to vector<4x128xf32>
    %166 = arith.mulf %164, %165 : vector<4x128xf32>
    %c0_191 = arith.constant 0 : index
    %c16_192 = arith.constant 16 : index
    %167 = vector.load %arg20[%c0_191, %c16_192] : memref<4x160xf32, #tpu.memory_space<vmem>>, vector<4x128xf32>
    tpu.vector_store %arg20[%c0_191, %c16_192], %166 {strides = array<i32>} : memref<4x160xf32, #tpu.memory_space<vmem>>, vector<4x128xf32>,
    %c0_193 = arith.constant 0 : index
    %c5_194 = arith.constant 5 : index
    %168 = vector.load %arg20[%c0_193, %c5_194] : memref<4x160xf32, #tpu.memory_space<vmem>>, vector<4x128xf32>
    %c0_195 = arith.constant 0 : index
    %c0_196 = arith.constant 0 : index
    %169 = vector.load %arg21[%c0_195, %c0_196] : memref<72x128xf32, #tpu.memory_space<vmem>>, vector<4x128xf32>
    tpu.vector_store %arg21[%c0_195, %c0_196], %168 {strides = array<i32>} : memref<72x128xf32, #tpu.memory_space<vmem>>, vector<4x128xf32>,
    %c0_197 = arith.constant 0 : index
    %c6_198 = arith.constant 6 : index
    %170 = vector.load %arg20[%c0_197, %c6_198] : memref<4x160xf32, #tpu.memory_space<vmem>>, vector<4x128xf32>
    %c8_199 = arith.constant 8 : index
    %c0_200 = arith.constant 0 : index
    %171 = vector.load %arg21[%c8_199, %c0_200] : memref<72x128xf32, #tpu.memory_space<vmem>>, vector<4x128xf32>
    tpu.vector_store %arg21[%c8_199, %c0_200], %170 {strides = array<i32>} : memref<72x128xf32, #tpu.memory_space<vmem>>, vector<4x128xf32>,
    %c0_201 = arith.constant 0 : index
    %c7_202 = arith.constant 7 : index
    %172 = vector.load %arg20[%c0_201, %c7_202] : memref<4x160xf32, #tpu.memory_space<vmem>>, vector<4x128xf32>
    %c16_203 = arith.constant 16 : index
    %c0_204 = arith.constant 0 : index
    %173 = vector.load %arg21[%c16_203, %c0_204] : memref<72x128xf32, #tpu.memory_space<vmem>>, vector<4x128xf32>
    tpu.vector_store %arg21[%c16_203, %c0_204], %172 {strides = array<i32>} : memref<72x128xf32, #tpu.memory_space<vmem>>, vector<4x128xf32>,
    %c0_205 = arith.constant 0 : index
    %c15_206 = arith.constant 15 : index
    %174 = vector.load %arg20[%c0_205, %c15_206] : memref<4x160xf32, #tpu.memory_space<vmem>>, vector<4x128xf32>
    %c24_207 = arith.constant 24 : index
    %c0_208 = arith.constant 0 : index
    %175 = vector.load %arg21[%c24_207, %c0_208] : memref<72x128xf32, #tpu.memory_space<vmem>>, vector<4x128xf32>
    tpu.vector_store %arg21[%c24_207, %c0_208], %174 {strides = array<i32>} : memref<72x128xf32, #tpu.memory_space<vmem>>, vector<4x128xf32>,
    %c0_209 = arith.constant 0 : index
    %c16_210 = arith.constant 16 : index
    %176 = vector.load %arg20[%c0_209, %c16_210] : memref<4x160xf32, #tpu.memory_space<vmem>>, vector<4x128xf32>
    %c32_211 = arith.constant 32 : index
    %c0_212 = arith.constant 0 : index
    %177 = vector.load %arg21[%c32_211, %c0_212] : memref<72x128xf32, #tpu.memory_space<vmem>>, vector<4x128xf32>
    tpu.vector_store %arg21[%c32_211, %c0_212], %176 {strides = array<i32>} : memref<72x128xf32, #tpu.memory_space<vmem>>, vector<4x128xf32>,
    %c0_213 = arith.constant 0 : index
    %c17_214 = arith.constant 17 : index
    %178 = vector.load %arg20[%c0_213, %c17_214] : memref<4x160xf32, #tpu.memory_space<vmem>>, vector<4x128xf32>
    %c40_215 = arith.constant 40 : index
    %c0_216 = arith.constant 0 : index
    %179 = vector.load %arg21[%c40_215, %c0_216] : memref<72x128xf32, #tpu.memory_space<vmem>>, vector<4x128xf32>
    tpu.vector_store %arg21[%c40_215, %c0_216], %178 {strides = array<i32>} : memref<72x128xf32, #tpu.memory_space<vmem>>, vector<4x128xf32>,
    %c0_217 = arith.constant 0 : index
    %c25_218 = arith.constant 25 : index
    %180 = vector.load %arg20[%c0_217, %c25_218] : memref<4x160xf32, #tpu.memory_space<vmem>>, vector<4x128xf32>
    %c48_219 = arith.constant 48 : index
    %c0_220 = arith.constant 0 : index
    %181 = vector.load %arg21[%c48_219, %c0_220] : memref<72x128xf32, #tpu.memory_space<vmem>>, vector<4x128xf32>
    tpu.vector_store %arg21[%c48_219, %c0_220], %180 {strides = array<i32>} : memref<72x128xf32, #tpu.memory_space<vmem>>, vector<4x128xf32>,
    %c0_221 = arith.constant 0 : index
    %c26_222 = arith.constant 26 : index
    %182 = vector.load %arg20[%c0_221, %c26_222] : memref<4x160xf32, #tpu.memory_space<vmem>>, vector<4x128xf32>
    %c56_223 = arith.constant 56 : index
    %c0_224 = arith.constant 0 : index
    %183 = vector.load %arg21[%c56_223, %c0_224] : memref<72x128xf32, #tpu.memory_space<vmem>>, vector<4x128xf32>
    tpu.vector_store %arg21[%c56_223, %c0_224], %182 {strides = array<i32>} : memref<72x128xf32, #tpu.memory_space<vmem>>, vector<4x128xf32>,
    %c0_225 = arith.constant 0 : index
    %c27_226 = arith.constant 27 : index
    %184 = vector.load %arg20[%c0_225, %c27_226] : memref<4x160xf32, #tpu.memory_space<vmem>>, vector<4x128xf32>
    %c64_227 = arith.constant 64 : index
    %c0_228 = arith.constant 0 : index
    %185 = vector.load %arg21[%c64_227, %c0_228] : memref<72x128xf32, #tpu.memory_space<vmem>>, vector<4x128xf32>
    tpu.vector_store %arg21[%c64_227, %c0_228], %184 {strides = array<i32>} : memref<72x128xf32, #tpu.memory_space<vmem>>, vector<4x128xf32>,
    %c0_229 = arith.constant 0 : index
    %c0_230 = arith.constant 0 : index
    %186 = vector.load %arg9[%c0_229, %c0_230] : memref<4x72xf32, #tpu.memory_space<vmem>>, vector<4x72xf32>
    %c0_231 = arith.constant 0 : index
    %c0_232 = arith.constant 0 : index
    %187 = vector.load %arg21[%c0_231, %c0_232] : memref<72x128xf32, #tpu.memory_space<vmem>>, vector<72x128xf32>
    %cst_233 = arith.constant dense<0.000000e+00> : vector<4x128xf32>
    %188 = tpu.matmul %186, %187, %cst_233 {dimension_numbers = #tpu.dot_dimension_numbers<[1], [0], [0], [1], [0, 0, 1, 1], [], []>} : vector<4x72xf32>, vector<72x128xf32>, vector<4x128xf32> -> vector<4x128xf32>
    %c0_234 = arith.constant 0 : index
    %c0_235 = arith.constant 0 : index
    %189 = vector.load %arg10[%c0_234, %c0_235] : memref<4x1xf32, #tpu.memory_space<vmem>>, vector<4x1xf32>
    %190 = vector.broadcast %189 : vector<4x1xf32> to vector<4x128xf32>
    %191 = arith.addf %188, %190 : vector<4x128xf32>
    %192 = vector.broadcast %0 : vector<1x128xf32> to vector<4x128xf32>
    %193 = arith.mulf %191, %192 : vector<4x128xf32>
    %c0_236 = arith.constant 0 : index
    %c0_237 = arith.constant 0 : index
    %194 = vector.load %arg11[%c0_236, %c0_237] : memref<4x1xf32, #tpu.memory_space<vmem>>, vector<4x1xf32>
    %c0_238 = arith.constant 0 : index
    %c0_239 = arith.constant 0 : index
    %195 = vector.load %arg12[%c0_238, %c0_239] : memref<4x1xf32, #tpu.memory_space<vmem>>, vector<4x1xf32>
    %196 = vector.shape_cast %193 : vector<4x128xf32> to vector<1x4x128xf32>
    %cst_240 = arith.constant dense<0.000000e+00> : vector<1xf32>
    %197 = vector.multi_reduction <add>, %196, %cst_240 [1, 2] : vector<1x4x128xf32> to vector<1xf32>
    %198 = vector.shape_cast %197 : vector<1xf32> to vector<1x1x1xf32>
    %199 = vector.extract %198[0, 0, 0] : f32 from vector<1x1x1xf32>
    %200 = arith.mulf %193, %193 : vector<4x128xf32>
    %201 = vector.shape_cast %200 : vector<4x128xf32> to vector<1x4x128xf32>
    %cst_241 = arith.constant dense<0.000000e+00> : vector<1xf32>
    %202 = vector.multi_reduction <add>, %201, %cst_241 [1, 2] : vector<1x4x128xf32> to vector<1xf32>
    %203 = vector.shape_cast %202 : vector<1xf32> to vector<1x1x1xf32>
    %204 = vector.extract %203[0, 0, 0] : f32 from vector<1x1x1xf32>
    %cst_242 = arith.constant 2.560000e+02 : f32
    %205 = arith.divf %199, %cst_242 : f32
    %cst_243 = arith.constant 2.560000e+02 : f32
    %206 = arith.divf %204, %cst_243 : f32
    %207 = arith.mulf %205, %205 : f32
    %208 = arith.subf %206, %207 : f32
    %cst_244 = arith.constant 9.99999974E-6 : f32
    %209 = arith.addf %208, %cst_244 : f32
    %210 = math.rsqrt %209 : f32
    %211 = vector.broadcast %205 : f32 to vector<4x128xf32>
    %212 = arith.subf %193, %211 : vector<4x128xf32>
    %213 = vector.broadcast %210 : f32 to vector<4x128xf32>
    %214 = arith.mulf %212, %213 : vector<4x128xf32>
    %215 = vector.broadcast %194 : vector<4x1xf32> to vector<4x128xf32>
    %216 = arith.mulf %214, %215 : vector<4x128xf32>
    %217 = vector.broadcast %195 : vector<4x1xf32> to vector<4x128xf32>
    %218 = arith.addf %216, %217 : vector<4x128xf32>
    %cst_245 = arith.constant 5.000000e-01 : f32
    %219 = vector.broadcast %cst_245 : f32 to vector<4x128xf32>
    %220 = arith.mulf %219, %218 : vector<4x128xf32>
    %cst_246 = arith.constant 0.707106769 : f32
    %221 = vector.broadcast %cst_246 : f32 to vector<4x128xf32>
    %222 = arith.mulf %218, %221 : vector<4x128xf32>
    %223 = math.erf %222 : vector<4x128xf32>
    %cst_247 = arith.constant 1.000000e+00 : f32
    %224 = vector.broadcast %cst_247 : f32 to vector<4x128xf32>
    %225 = arith.addf %224, %223 : vector<4x128xf32>
    %226 = arith.mulf %220, %225 : vector<4x128xf32>
    %227 = vector.broadcast %0 : vector<1x128xf32> to vector<4x128xf32>
    %228 = arith.mulf %226, %227 : vector<4x128xf32>
    %c0_248 = arith.constant 0 : index
    %c16_249 = arith.constant 16 : index
    %229 = vector.load %arg20[%c0_248, %c16_249] : memref<4x160xf32, #tpu.memory_space<vmem>>, vector<4x128xf32>
    tpu.vector_store %arg20[%c0_248, %c16_249], %228 {strides = array<i32>} : memref<4x160xf32, #tpu.memory_space<vmem>>, vector<4x128xf32>,
    %c0_250 = arith.constant 0 : index
    %c5_251 = arith.constant 5 : index
    %230 = vector.load %arg20[%c0_250, %c5_251] : memref<4x160xf32, #tpu.memory_space<vmem>>, vector<4x128xf32>
    %c0_252 = arith.constant 0 : index
    %c0_253 = arith.constant 0 : index
    %231 = vector.load %arg21[%c0_252, %c0_253] : memref<72x128xf32, #tpu.memory_space<vmem>>, vector<4x128xf32>
    tpu.vector_store %arg21[%c0_252, %c0_253], %230 {strides = array<i32>} : memref<72x128xf32, #tpu.memory_space<vmem>>, vector<4x128xf32>,
    %c0_254 = arith.constant 0 : index
    %c6_255 = arith.constant 6 : index
    %232 = vector.load %arg20[%c0_254, %c6_255] : memref<4x160xf32, #tpu.memory_space<vmem>>, vector<4x128xf32>
    %c8_256 = arith.constant 8 : index
    %c0_257 = arith.constant 0 : index
    %233 = vector.load %arg21[%c8_256, %c0_257] : memref<72x128xf32, #tpu.memory_space<vmem>>, vector<4x128xf32>
    tpu.vector_store %arg21[%c8_256, %c0_257], %232 {strides = array<i32>} : memref<72x128xf32, #tpu.memory_space<vmem>>, vector<4x128xf32>,
    %c0_258 = arith.constant 0 : index
    %c7_259 = arith.constant 7 : index
    %234 = vector.load %arg20[%c0_258, %c7_259] : memref<4x160xf32, #tpu.memory_space<vmem>>, vector<4x128xf32>
    %c16_260 = arith.constant 16 : index
    %c0_261 = arith.constant 0 : index
    %235 = vector.load %arg21[%c16_260, %c0_261] : memref<72x128xf32, #tpu.memory_space<vmem>>, vector<4x128xf32>
    tpu.vector_store %arg21[%c16_260, %c0_261], %234 {strides = array<i32>} : memref<72x128xf32, #tpu.memory_space<vmem>>, vector<4x128xf32>,
    %c0_262 = arith.constant 0 : index
    %c15_263 = arith.constant 15 : index
    %236 = vector.load %arg20[%c0_262, %c15_263] : memref<4x160xf32, #tpu.memory_space<vmem>>, vector<4x128xf32>
    %c24_264 = arith.constant 24 : index
    %c0_265 = arith.constant 0 : index
    %237 = vector.load %arg21[%c24_264, %c0_265] : memref<72x128xf32, #tpu.memory_space<vmem>>, vector<4x128xf32>
    tpu.vector_store %arg21[%c24_264, %c0_265], %236 {strides = array<i32>} : memref<72x128xf32, #tpu.memory_space<vmem>>, vector<4x128xf32>,
    %c0_266 = arith.constant 0 : index
    %c16_267 = arith.constant 16 : index
    %238 = vector.load %arg20[%c0_266, %c16_267] : memref<4x160xf32, #tpu.memory_space<vmem>>, vector<4x128xf32>
    %c32_268 = arith.constant 32 : index
    %c0_269 = arith.constant 0 : index
    %239 = vector.load %arg21[%c32_268, %c0_269] : memref<72x128xf32, #tpu.memory_space<vmem>>, vector<4x128xf32>
    tpu.vector_store %arg21[%c32_268, %c0_269], %238 {strides = array<i32>} : memref<72x128xf32, #tpu.memory_space<vmem>>, vector<4x128xf32>,
    %c0_270 = arith.constant 0 : index
    %c17_271 = arith.constant 17 : index
    %240 = vector.load %arg20[%c0_270, %c17_271] : memref<4x160xf32, #tpu.memory_space<vmem>>, vector<4x128xf32>
    %c40_272 = arith.constant 40 : index
    %c0_273 = arith.constant 0 : index
    %241 = vector.load %arg21[%c40_272, %c0_273] : memref<72x128xf32, #tpu.memory_space<vmem>>, vector<4x128xf32>
    tpu.vector_store %arg21[%c40_272, %c0_273], %240 {strides = array<i32>} : memref<72x128xf32, #tpu.memory_space<vmem>>, vector<4x128xf32>,
    %c0_274 = arith.constant 0 : index
    %c25_275 = arith.constant 25 : index
    %242 = vector.load %arg20[%c0_274, %c25_275] : memref<4x160xf32, #tpu.memory_space<vmem>>, vector<4x128xf32>
    %c48_276 = arith.constant 48 : index
    %c0_277 = arith.constant 0 : index
    %243 = vector.load %arg21[%c48_276, %c0_277] : memref<72x128xf32, #tpu.memory_space<vmem>>, vector<4x128xf32>
    tpu.vector_store %arg21[%c48_276, %c0_277], %242 {strides = array<i32>} : memref<72x128xf32, #tpu.memory_space<vmem>>, vector<4x128xf32>,
    %c0_278 = arith.constant 0 : index
    %c26_279 = arith.constant 26 : index
    %244 = vector.load %arg20[%c0_278, %c26_279] : memref<4x160xf32, #tpu.memory_space<vmem>>, vector<4x128xf32>
    %c56_280 = arith.constant 56 : index
    %c0_281 = arith.constant 0 : index
    %245 = vector.load %arg21[%c56_280, %c0_281] : memref<72x128xf32, #tpu.memory_space<vmem>>, vector<4x128xf32>
    tpu.vector_store %arg21[%c56_280, %c0_281], %244 {strides = array<i32>} : memref<72x128xf32, #tpu.memory_space<vmem>>, vector<4x128xf32>,
    %c0_282 = arith.constant 0 : index
    %c27_283 = arith.constant 27 : index
    %246 = vector.load %arg20[%c0_282, %c27_283] : memref<4x160xf32, #tpu.memory_space<vmem>>, vector<4x128xf32>
    %c64_284 = arith.constant 64 : index
    %c0_285 = arith.constant 0 : index
    %247 = vector.load %arg21[%c64_284, %c0_285] : memref<72x128xf32, #tpu.memory_space<vmem>>, vector<4x128xf32>
    tpu.vector_store %arg21[%c64_284, %c0_285], %246 {strides = array<i32>} : memref<72x128xf32, #tpu.memory_space<vmem>>, vector<4x128xf32>,
    %c0_286 = arith.constant 0 : index
    %c0_287 = arith.constant 0 : index
    %248 = vector.load %arg13[%c0_286, %c0_287] : memref<4x72xf32, #tpu.memory_space<vmem>>, vector<4x72xf32>
    %c0_288 = arith.constant 0 : index
    %c0_289 = arith.constant 0 : index
    %249 = vector.load %arg21[%c0_288, %c0_289] : memref<72x128xf32, #tpu.memory_space<vmem>>, vector<72x128xf32>
    %cst_290 = arith.constant dense<0.000000e+00> : vector<4x128xf32>
    %250 = tpu.matmul %248, %249, %cst_290 {dimension_numbers = #tpu.dot_dimension_numbers<[1], [0], [0], [1], [0, 0, 1, 1], [], []>} : vector<4x72xf32>, vector<72x128xf32>, vector<4x128xf32> -> vector<4x128xf32>
    %c0_291 = arith.constant 0 : index
    %c0_292 = arith.constant 0 : index
    %251 = vector.load %arg14[%c0_291, %c0_292] : memref<4x1xf32, #tpu.memory_space<vmem>>, vector<4x1xf32>
    %252 = vector.broadcast %251 : vector<4x1xf32> to vector<4x128xf32>
    %253 = arith.addf %250, %252 : vector<4x128xf32>
    %254 = vector.broadcast %0 : vector<1x128xf32> to vector<4x128xf32>
    %255 = arith.mulf %253, %254 : vector<4x128xf32>
    %c0_293 = arith.constant 0 : index
    %c0_294 = arith.constant 0 : index
    %256 = vector.load %arg15[%c0_293, %c0_294] : memref<4x1xf32, #tpu.memory_space<vmem>>, vector<4x1xf32>
    %c0_295 = arith.constant 0 : index
    %c0_296 = arith.constant 0 : index
    %257 = vector.load %arg16[%c0_295, %c0_296] : memref<4x1xf32, #tpu.memory_space<vmem>>, vector<4x1xf32>
    %258 = vector.shape_cast %255 : vector<4x128xf32> to vector<1x4x128xf32>
    %cst_297 = arith.constant dense<0.000000e+00> : vector<1xf32>
    %259 = vector.multi_reduction <add>, %258, %cst_297 [1, 2] : vector<1x4x128xf32> to vector<1xf32>
    %260 = vector.shape_cast %259 : vector<1xf32> to vector<1x1x1xf32>
    %261 = vector.extract %260[0, 0, 0] : f32 from vector<1x1x1xf32>
    %262 = arith.mulf %255, %255 : vector<4x128xf32>
    %263 = vector.shape_cast %262 : vector<4x128xf32> to vector<1x4x128xf32>
    %cst_298 = arith.constant dense<0.000000e+00> : vector<1xf32>
    %264 = vector.multi_reduction <add>, %263, %cst_298 [1, 2] : vector<1x4x128xf32> to vector<1xf32>
    %265 = vector.shape_cast %264 : vector<1xf32> to vector<1x1x1xf32>
    %266 = vector.extract %265[0, 0, 0] : f32 from vector<1x1x1xf32>
    %cst_299 = arith.constant 2.560000e+02 : f32
    %267 = arith.divf %261, %cst_299 : f32
    %cst_300 = arith.constant 2.560000e+02 : f32
    %268 = arith.divf %266, %cst_300 : f32
    %269 = arith.mulf %267, %267 : f32
    %270 = arith.subf %268, %269 : f32
    %cst_301 = arith.constant 9.99999974E-6 : f32
    %271 = arith.addf %270, %cst_301 : f32
    %272 = math.rsqrt %271 : f32
    %273 = vector.broadcast %267 : f32 to vector<4x128xf32>
    %274 = arith.subf %255, %273 : vector<4x128xf32>
    %275 = vector.broadcast %272 : f32 to vector<4x128xf32>
    %276 = arith.mulf %274, %275 : vector<4x128xf32>
    %277 = vector.broadcast %256 : vector<4x1xf32> to vector<4x128xf32>
    %278 = arith.mulf %276, %277 : vector<4x128xf32>
    %279 = vector.broadcast %257 : vector<4x1xf32> to vector<4x128xf32>
    %280 = arith.addf %278, %279 : vector<4x128xf32>
    %cst_302 = arith.constant 5.000000e-01 : f32
    %281 = vector.broadcast %cst_302 : f32 to vector<4x128xf32>
    %282 = arith.mulf %281, %280 : vector<4x128xf32>
    %cst_303 = arith.constant 0.707106769 : f32
    %283 = vector.broadcast %cst_303 : f32 to vector<4x128xf32>
    %284 = arith.mulf %280, %283 : vector<4x128xf32>
    %285 = math.erf %284 : vector<4x128xf32>
    %cst_304 = arith.constant 1.000000e+00 : f32
    %286 = vector.broadcast %cst_304 : f32 to vector<4x128xf32>
    %287 = arith.addf %286, %285 : vector<4x128xf32>
    %288 = arith.mulf %282, %287 : vector<4x128xf32>
    %289 = vector.broadcast %0 : vector<1x128xf32> to vector<4x128xf32>
    %290 = arith.mulf %288, %289 : vector<4x128xf32>
    %c0_305 = arith.constant 0 : index
    %c0_306 = arith.constant 0 : index
    %c0_307 = arith.constant 0 : index
    %291 = vector.load %arg17[%c0_305, %c0_306, %c0_307] : memref<4x4x128xf32, #tpu.memory_space<vmem>>, vector<1x4x128xf32>
    %292 = vector.shape_cast %291 : vector<1x4x128xf32> to vector<4x128xf32>
    %293 = arith.mulf %290, %292 : vector<4x128xf32>
    %294 = vector.shape_cast %293 : vector<4x128xf32> to vector<1x4x128xf32>
    %cst_308 = arith.constant dense<0.000000e+00> : vector<1xf32>
    %295 = vector.multi_reduction <add>, %294, %cst_308 [1, 2] : vector<1x4x128xf32> to vector<1xf32>
    %296 = vector.shape_cast %295 : vector<1xf32> to vector<1x1x1xf32>
    %297 = vector.extract %296[0, 0, 0] : f32 from vector<1x1x1xf32>
    %c0_309 = arith.constant 0 : index
    %c0_310 = arith.constant 0 : index
    %298 = vector.load %arg18[%c0_309, %c0_310] : memref<1x4xf32, #tpu.memory_space<vmem>>, vector<1x1xf32>
    %299 = vector.broadcast %297 : f32 to vector<1x1xf32>
    %300 = arith.addf %299, %298 : vector<1x1xf32>
    %c1_311 = arith.constant 1 : index
    %c0_312 = arith.constant 0 : index
    %c0_313 = arith.constant 0 : index
    %301 = vector.load %arg17[%c1_311, %c0_312, %c0_313] : memref<4x4x128xf32, #tpu.memory_space<vmem>>, vector<1x4x128xf32>
    %302 = vector.shape_cast %301 : vector<1x4x128xf32> to vector<4x128xf32>
    %303 = arith.mulf %290, %302 : vector<4x128xf32>
    %304 = vector.shape_cast %303 : vector<4x128xf32> to vector<1x4x128xf32>
    %cst_314 = arith.constant dense<0.000000e+00> : vector<1xf32>
    %305 = vector.multi_reduction <add>, %304, %cst_314 [1, 2] : vector<1x4x128xf32> to vector<1xf32>
    %306 = vector.shape_cast %305 : vector<1xf32> to vector<1x1x1xf32>
    %307 = vector.extract %306[0, 0, 0] : f32 from vector<1x1x1xf32>
    %c0_315 = arith.constant 0 : index
    %c1_316 = arith.constant 1 : index
    %308 = vector.load %arg18[%c0_315, %c1_316] : memref<1x4xf32, #tpu.memory_space<vmem>>, vector<1x1xf32>
    %309 = vector.broadcast %307 : f32 to vector<1x1xf32>
    %310 = arith.addf %309, %308 : vector<1x1xf32>
    %c2_317 = arith.constant 2 : index
    %c0_318 = arith.constant 0 : index
    %c0_319 = arith.constant 0 : index
    %311 = vector.load %arg17[%c2_317, %c0_318, %c0_319] : memref<4x4x128xf32, #tpu.memory_space<vmem>>, vector<1x4x128xf32>
    %312 = vector.shape_cast %311 : vector<1x4x128xf32> to vector<4x128xf32>
    %313 = arith.mulf %290, %312 : vector<4x128xf32>
    %314 = vector.shape_cast %313 : vector<4x128xf32> to vector<1x4x128xf32>
    %cst_320 = arith.constant dense<0.000000e+00> : vector<1xf32>
    %315 = vector.multi_reduction <add>, %314, %cst_320 [1, 2] : vector<1x4x128xf32> to vector<1xf32>
    %316 = vector.shape_cast %315 : vector<1xf32> to vector<1x1x1xf32>
    %317 = vector.extract %316[0, 0, 0] : f32 from vector<1x1x1xf32>
    %c0_321 = arith.constant 0 : index
    %c2_322 = arith.constant 2 : index
    %318 = vector.load %arg18[%c0_321, %c2_322] : memref<1x4xf32, #tpu.memory_space<vmem>>, vector<1x1xf32>
    %319 = vector.broadcast %317 : f32 to vector<1x1xf32>
    %320 = arith.addf %319, %318 : vector<1x1xf32>
    %c3_323 = arith.constant 3 : index
    %c0_324 = arith.constant 0 : index
    %c0_325 = arith.constant 0 : index
    %321 = vector.load %arg17[%c3_323, %c0_324, %c0_325] : memref<4x4x128xf32, #tpu.memory_space<vmem>>, vector<1x4x128xf32>
    %322 = vector.shape_cast %321 : vector<1x4x128xf32> to vector<4x128xf32>
    %323 = arith.mulf %290, %322 : vector<4x128xf32>
    %324 = vector.shape_cast %323 : vector<4x128xf32> to vector<1x4x128xf32>
    %cst_326 = arith.constant dense<0.000000e+00> : vector<1xf32>
    %325 = vector.multi_reduction <add>, %324, %cst_326 [1, 2] : vector<1x4x128xf32> to vector<1xf32>
    %326 = vector.shape_cast %325 : vector<1xf32> to vector<1x1x1xf32>
    %327 = vector.extract %326[0, 0, 0] : f32 from vector<1x1x1xf32>
    %c0_327 = arith.constant 0 : index
    %c3_328 = arith.constant 3 : index
    %328 = vector.load %arg18[%c0_327, %c3_328] : memref<1x4xf32, #tpu.memory_space<vmem>>, vector<1x1xf32>
    %329 = vector.broadcast %327 : f32 to vector<1x1xf32>
    %330 = arith.addf %329, %328 : vector<1x1xf32>
    %331 = arith.maximumf %300, %310 : vector<1x1xf32>
    %332 = arith.maximumf %331, %320 : vector<1x1xf32>
    %333 = arith.maximumf %332, %330 : vector<1x1xf32>
    %334 = arith.subf %300, %333 : vector<1x1xf32>
    %335 = math.exp %334 : vector<1x1xf32>
    %336 = arith.subf %310, %333 : vector<1x1xf32>
    %337 = math.exp %336 : vector<1x1xf32>
    %338 = arith.subf %320, %333 : vector<1x1xf32>
    %339 = math.exp %338 : vector<1x1xf32>
    %340 = arith.subf %330, %333 : vector<1x1xf32>
    %341 = math.exp %340 : vector<1x1xf32>
    %342 = arith.addf %335, %337 : vector<1x1xf32>
    %343 = arith.addf %342, %339 : vector<1x1xf32>
    %344 = arith.addf %343, %341 : vector<1x1xf32>
    %345 = arith.divf %335, %344 : vector<1x1xf32>
    %346 = arith.divf %337, %344 : vector<1x1xf32>
    %347 = arith.divf %339, %344 : vector<1x1xf32>
    %348 = arith.divf %341, %344 : vector<1x1xf32>
    %c0_329 = arith.constant 0 : index
    %c0_330 = arith.constant 0 : index
    %c0_331 = arith.constant 0 : index
    %349 = vector.load %arg19[%c0_329, %c0_330, %c0_331] : memref<1x1x4xf32, #tpu.memory_space<vmem>>, vector<1x1x1xf32>
    %350 = vector.shape_cast %349 : vector<1x1x1xf32> to vector<1x1xf32>
    %351 = vector.shape_cast %345 : vector<1x1xf32> to vector<1x1x1xf32>
    tpu.vector_store %arg19[%c0_329, %c0_330, %c0_331], %351 {strides = array<i32>} : memref<1x1x4xf32, #tpu.memory_space<vmem>>, vector<1x1x1xf32>,
    %c0_332 = arith.constant 0 : index
    %c0_333 = arith.constant 0 : index
    %c1_334 = arith.constant 1 : index
    %352 = vector.load %arg19[%c0_332, %c0_333, %c1_334] : memref<1x1x4xf32, #tpu.memory_space<vmem>>, vector<1x1x1xf32>
    %353 = vector.shape_cast %352 : vector<1x1x1xf32> to vector<1x1xf32>
    %354 = vector.shape_cast %346 : vector<1x1xf32> to vector<1x1x1xf32>
    tpu.vector_store %arg19[%c0_332, %c0_333, %c1_334], %354 {strides = array<i32>} : memref<1x1x4xf32, #tpu.memory_space<vmem>>, vector<1x1x1xf32>,
    %c0_335 = arith.constant 0 : index
    %c0_336 = arith.constant 0 : index
    %c2_337 = arith.constant 2 : index
    %355 = vector.load %arg19[%c0_335, %c0_336, %c2_337] : memref<1x1x4xf32, #tpu.memory_space<vmem>>, vector<1x1x1xf32>
    %356 = vector.shape_cast %355 : vector<1x1x1xf32> to vector<1x1xf32>
    %357 = vector.shape_cast %347 : vector<1x1xf32> to vector<1x1x1xf32>
    tpu.vector_store %arg19[%c0_335, %c0_336, %c2_337], %357 {strides = array<i32>} : memref<1x1x4xf32, #tpu.memory_space<vmem>>, vector<1x1x1xf32>,
    %c0_338 = arith.constant 0 : index
    %c0_339 = arith.constant 0 : index
    %c3_340 = arith.constant 3 : index
    %358 = vector.load %arg19[%c0_338, %c0_339, %c3_340] : memref<1x1x4xf32, #tpu.memory_space<vmem>>, vector<1x1x1xf32>
    %359 = vector.shape_cast %358 : vector<1x1x1xf32> to vector<1x1xf32>
    %360 = vector.shape_cast %348 : vector<1x1xf32> to vector<1x1x1xf32>
    tpu.vector_store %arg19[%c0_338, %c0_339, %c3_340], %360 {strides = array<i32>} : memref<1x1x4xf32, #tpu.memory_space<vmem>>, vector<1x1x1xf32>,
    return
  }
  func.func @transform_0(%arg0: i32) -> (i32, i32, i32, i32) {
    %c0_i32 = arith.constant 0 : i32
    %c0_i32_0 = arith.constant 0 : i32
    %c0_i32_1 = arith.constant 0 : i32
    %c0_i32_2 = arith.constant 0 : i32
    return %arg0, %c0_i32, %c0_i32_0, %c0_i32_1 : i32, i32, i32, i32
  }
  func.func @transform_1(%arg0: i32) -> (i32, i32) {
    %c0_i32 = arith.constant 0 : i32
    %c0_i32_0 = arith.constant 0 : i32
    %c0_i32_1 = arith.constant 0 : i32
    return %c0_i32, %c0_i32_0 : i32, i32
  }
  func.func @transform_2(%arg0: i32) -> (i32, i32) {
    %c0_i32 = arith.constant 0 : i32
    %c0_i32_0 = arith.constant 0 : i32
    %c0_i32_1 = arith.constant 0 : i32
    return %c0_i32, %c0_i32_0 : i32, i32
  }
  func.func @transform_3(%arg0: i32) -> (i32, i32) {
    %c0_i32 = arith.constant 0 : i32
    %c0_i32_0 = arith.constant 0 : i32
    %c0_i32_1 = arith.constant 0 : i32
    return %c0_i32, %c0_i32_0 : i32, i32
  }
  func.func @transform_4(%arg0: i32) -> (i32, i32) {
    %c0_i32 = arith.constant 0 : i32
    %c0_i32_0 = arith.constant 0 : i32
    %c0_i32_1 = arith.constant 0 : i32
    return %c0_i32, %c0_i32_0 : i32, i32
  }
  func.func @transform_5(%arg0: i32) -> (i32, i32) {
    %c0_i32 = arith.constant 0 : i32
    %c0_i32_0 = arith.constant 0 : i32
    %c0_i32_1 = arith.constant 0 : i32
    return %c0_i32, %c0_i32_0 : i32, i32
  }
  func.func @transform_6(%arg0: i32) -> (i32, i32) {
    %c0_i32 = arith.constant 0 : i32
    %c0_i32_0 = arith.constant 0 : i32
    %c0_i32_1 = arith.constant 0 : i32
    return %c0_i32, %c0_i32_0 : i32, i32
  }
  func.func @transform_7(%arg0: i32) -> (i32, i32) {
    %c0_i32 = arith.constant 0 : i32
    %c0_i32_0 = arith.constant 0 : i32
    %c0_i32_1 = arith.constant 0 : i32
    return %c0_i32, %c0_i32_0 : i32, i32
  }
  func.func @transform_8(%arg0: i32) -> (i32, i32) {
    %c0_i32 = arith.constant 0 : i32
    %c0_i32_0 = arith.constant 0 : i32
    %c0_i32_1 = arith.constant 0 : i32
    return %c0_i32, %c0_i32_0 : i32, i32
  }
  func.func @transform_9(%arg0: i32) -> (i32, i32) {
    %c0_i32 = arith.constant 0 : i32
    %c0_i32_0 = arith.constant 0 : i32
    %c0_i32_1 = arith.constant 0 : i32
    return %c0_i32, %c0_i32_0 : i32, i32
  }
  func.func @transform_10(%arg0: i32) -> (i32, i32) {
    %c0_i32 = arith.constant 0 : i32
    %c0_i32_0 = arith.constant 0 : i32
    %c0_i32_1 = arith.constant 0 : i32
    return %c0_i32, %c0_i32_0 : i32, i32
  }
  func.func @transform_11(%arg0: i32) -> (i32, i32) {
    %c0_i32 = arith.constant 0 : i32
    %c0_i32_0 = arith.constant 0 : i32
    %c0_i32_1 = arith.constant 0 : i32
    return %c0_i32, %c0_i32_0 : i32, i32
  }
  func.func @transform_12(%arg0: i32) -> (i32, i32) {
    %c0_i32 = arith.constant 0 : i32
    %c0_i32_0 = arith.constant 0 : i32
    %c0_i32_1 = arith.constant 0 : i32
    return %c0_i32, %c0_i32_0 : i32, i32
  }
  func.func @transform_13(%arg0: i32) -> (i32, i32) {
    %c0_i32 = arith.constant 0 : i32
    %c0_i32_0 = arith.constant 0 : i32
    %c0_i32_1 = arith.constant 0 : i32
    return %c0_i32, %c0_i32_0 : i32, i32
  }
  func.func @transform_14(%arg0: i32) -> (i32, i32) {
    %c0_i32 = arith.constant 0 : i32
    %c0_i32_0 = arith.constant 0 : i32
    %c0_i32_1 = arith.constant 0 : i32
    return %c0_i32, %c0_i32_0 : i32, i32
  }
  func.func @transform_15(%arg0: i32) -> (i32, i32) {
    %c0_i32 = arith.constant 0 : i32
    %c0_i32_0 = arith.constant 0 : i32
    %c0_i32_1 = arith.constant 0 : i32
    return %c0_i32, %c0_i32_0 : i32, i32
  }
  func.func @transform_16(%arg0: i32) -> (i32, i32, i32) {
    %c0_i32 = arith.constant 0 : i32
    %c0_i32_0 = arith.constant 0 : i32
    %c0_i32_1 = arith.constant 0 : i32
    %c0_i32_2 = arith.constant 0 : i32
    return %c0_i32, %c0_i32_0, %c0_i32_1 : i32, i32, i32
  }
  func.func @transform_17(%arg0: i32) -> (i32, i32) {
    %c0_i32 = arith.constant 0 : i32
    %c0_i32_0 = arith.constant 0 : i32
    %c0_i32_1 = arith.constant 0 : i32
    return %c0_i32, %c0_i32_0 : i32, i32
  }
  func.func @transform_18(%arg0: i32) -> (i32, i32, i32) {
    %c0_i32 = arith.constant 0 : i32
    %c0_i32_0 = arith.constant 0 : i32
    %c0_i32_1 = arith.constant 0 : i32
    return %arg0, %c0_i32, %c0_i32_0 : i32, i32, i32
  }
}

</mosaic_0001>

<bundles_post_ra>
// kernel: model_forward.1
= control target key start
LH: loop header
LB: loop body
LE: loop exit
PB: predicated region body
PF: predicated region fallthrough
CT: control target
= control target key end

     0   :  { %s2748_s0 = inlined_call_operand.vmem [shape: f32[2,3,8,8], index: 0, kind: input, shape index: {}]   ;;  %s2749_s1 = inlined_call_operand.vmem [shape: f32[1,128], index: 1, kind: input, shape index: {}]   ;;  %s2750_s2 = inlined_call_operand.vmem [shape: f32[3,1], index: 2, kind: input, shape index: {}]   ;;  %s2751_s3 = inlined_call_operand.vmem [shape: f32[3,1], index: 3, kind: input, shape index: {}]   ;;  %s2752_s4 = inlined_call_operand.hbm [shape: f32[4,72], index: 4, kind: input, shape index: {}]   ;;  %s2753_s5 = inlined_call_operand.vmem [shape: f32[4,1], index: 5, kind: input, shape index: {}]   ;;  %s2754_s6 = inlined_call_operand.vmem [shape: f32[4,1], index: 6, kind: input, shape index: {}]   ;;  %s2755_s7 = inlined_call_operand.vmem [shape: f32[4,1], index: 7, kind: input, shape index: {}]   ;;  %s2756_s8 = inlined_call_operand.hbm [shape: f32[4,72], index: 8, kind: input, shape index: {}]   ;;  %s2757_s9 = inlined_call_operand.vmem [shape: f32[4,1], index: 9, kind: input, shape index: {}]   ;;  %s2758_s10 = inlined_call_operand.vmem [shape: f32[4,1], index: 10, kind: input, shape index: {}]   ;;  %s2759_s11 = inlined_call_operand.vmem [shape: f32[4,1], index: 11, kind: input, shape index: {}]   ;;  %s2760_s12 = inlined_call_operand.vmem [shape: f32[4,72], index: 12, kind: input, shape index: {}]   ;;  %s2761_s13 = inlined_call_operand.vmem [shape: f32[4,1], index: 13, kind: input, shape index: {}]   ;;  %s2762_s14 = inlined_call_operand.vmem [shape: f32[4,1], index: 14, kind: input, shape index: {}]   ;;  %s2763_s15 = inlined_call_operand.vmem [shape: f32[4,1], index: 15, kind: input, shape index: {}]   ;;  %s2764_s16 = inlined_call_operand.vmem [shape: f32[4,4,128], index: 16, kind: input, shape index: {}]   ;;  %s2765_s17 = inlined_call_operand.vmem [shape: f32[1,4], index: 17, kind: input, shape index: {}]   ;;  %s2766_s18 = inlined_call_operand.hbm [shape: f32[2,1,4], index: 18, kind: output, shape index: {}]  }
   0x1   :  { %2795 = sst [smem:[#allocation17_spill]] %s2748_s0 }
   0x2   :  { %2796 = sst [smem:[#allocation18_spill]] %s2749_s1 }
   0x3   :  { %2797 = sst [smem:[#allocation19_spill]] %s2750_s2 }
   0x4   :  { %2798 = sst [smem:[#allocation20_spill]] %s2751_s3 }
   0x5   :  { %2799 = sst [smem:[#allocation21_spill]] %s2752_s4 }
   0x6   :  { %2800 = sst [smem:[#allocation22_spill]] %s2753_s5 }
   0x7   :  { %2801 = sst [smem:[#allocation23_spill]] %s2754_s6 }
   0x8   :  { %2802 = sst [smem:[#allocation24_spill]] %s2755_s7 }
   0x9   :  { %2803 = sst [smem:[#allocation25_spill]] %s2756_s8 }
   0xa   :  { %2804 = sst [smem:[#allocation26_spill]] %s2757_s9 }
   0xb   :  { %2805 = sst [smem:[#allocation27_spill]] %s2758_s10 }
   0xc   :  { %2806 = sst [smem:[#allocation28_spill]] %s2759_s11 }
   0xd   :  { %23 = vsyncpa [#allocation5], 0 }
   0xe   :  { %24 = vsyncpa [#allocation8], 0 }
   0xf   :  { %25 = vsyncpa [#allocation6], 0 }
  0x10   :  { %27 = vsyncpa [#allocation6 + $0x1], 0  ;;  %s2359_s27 = smov 0   ;;  %s2361_s28 = smov 0  }
  0x11   :  { %s2363_s29 = smov 0   ;;  %s2365_s30 = smov 0  }
  0x12 LB: > { %2807 = sst [smem:[#allocation13_spill]] %s2228_s29  ;;  %s2380_s0 = sadd.s32 4294967295, %s2232_s30   ;;  %s2232_s30 = sphi %s2365_s30, %s2847_s30   ;;  %s2228_s29 = sphi %s2363_s29, %s2849_s29   ;;  %s2224_s28 = sphi %s2361_s28, %s2851_s28   ;;  %s2220_s27 = sphi %s2359_s27, %s2850_s27  }
  0x13   : > { %s1819_s19 = sadd.s32 4294967294, %s2232_s30   ;;  %s2384_s1 = sadd.s32 1, %s2232_s30  }
  0x14   : > { %2808 = sst [smem:[#allocation14_spill]] %s2384_s1  ;;  %s423_s20 = sadd.s32 1, %s2228_s29 }
  0x15   : > { %s420_s21 = ssub.s32 %s2232_s30, %s2384_s1  ;;  %p433_p0 = scmp.ne.s32.totalorder %s2228_s29, %s2224_s28 }
  0x16   : > { %p421_p1 = scmp.eq.s32.totalorder %s420_s21, 0  ;;  %p434_p2 = scmp.eq.s32.totalorder %s2380_s0, 1 }
  0x17   : > { %p439_p3 = scmp.ne.s32.totalorder %s2224_s28, %s2220_s27  ;;  %p440_p4 = scmp.eq.s32.totalorder %s1819_s19, 1 }
  0x18   : > { %s2395_s22 = scalar_select %p421_p1, %s2228_s29, %s423_s20  }
  0x19   : > { %p2397_p5 = por %p434_p2, %p433_p0  ;;  %p2401_p6 = por %p440_p4, %p439_p3 }
  0x1a   : > { %2809 = sst [smem:[#allocation15_spill]] %s2395_s22  ;;  %p1820_p7 = scmp.ge.s32.totalorder %s2232_s30, 1 }
  0x1b   : > { %s2810_s2 = scalar_select %p2397_p5, 1, 0 }
  0x1c   : > { %s2811_s23 = scalar_select %p2401_p6, 1, 0 }
  0x1d   : > { %p447_p8 = scmp.lt.s32.totalorder %s2232_s30, 3  ;;  %p2769_p9 = scmp.eq.s32.totalorder %s2380_s0, 0 }
  0x1e   : > { %2812 = sst [smem:[#allocation16_spill]] %s2811_s23  ;;  %s2234_s25 = smov [#allocation4]  }
  0x1f   : > { %p2408_p10 = pnand %p1820_p7, %p447_p8  ;;  %s469_s26 = sshll.u32 %s2234_s25, 4  ;;  %s470_s26 = int_to_ptr.vmem [resolvable:$true] %s469_s26 }
  0x20   : > { %s2235_s19 = smov [#allocation7]   ;;  %s2123_s22 = scalar_lea.vmem %s470_s26, 64 }
  0x21   : > { %s2813_s24 = scalar_select %p2408_p10, 1, 0 }
  0x22   : > { %p1990_p11 = pneg %p2408_p10  ;;  %s489_s20 = sshll.u32 %s2235_s19, 4  ;;  %s490_s20 = int_to_ptr.vmem [resolvable:$true] %s489_s20 }
  0x23   : > { %p2124_p0 = scmp.ne.s32.totalorder %s470_s26, %s2123_s22  ;;  %p2131_p3 = scmp.lt.s32.totalorder %s470_s26, %s470_s26 }
  0x24   : > { %p2416_p12 = pnand %p2769_p9, %p1990_p11  ;;  %p2132_p4 = scmp.lt.s32.totalorder %s2123_s22, %s2123_s22 }
  0x26   : > { %p2114_p13 = pneg %p2416_p12  ;;  %p2133_p7 = por %p2132_p4, %p2131_p3 }
  0x28   : > { %p2126_p1 = pnand %p2124_p0, %p2114_p13 }
  0x2a   : > { %p2127_p2 = pneg %p2126_p1 }
  0x2c   : > { %p2134_p8 = pnand %p2133_p7, %p2127_p2 }
  0x2e   : > { %2137 = shalt.err (!%p2134_p8)
}
  0x2f   : > { %s2815_s4 = sld [smem:[#allocation21_spill]]  ;;  %s2149_s29 = scalar_lea.vmem %s490_s20, 64 }
  0x30   : > { %p2150_p11 = scmp.ne.s32.totalorder %s490_s20, %s2149_s29  ;;  %p2157_p0 = scmp.lt.s32.totalorder %s490_s20, %s490_s20 }
  0x31   : > { %p2158_p1 = scmp.lt.s32.totalorder %s2149_s29, %s2149_s29 }
  0x32   : > { %p2152_p9 = pnand %p2150_p11, %p2114_p13 }
  0x33   : > { %p2159_p5 = por %p2158_p1, %p2157_p0 }
  0x34   : > { %p2153_p6 = pneg %p2152_p9 }
  0x35   : > { %1993 = dma.hbm_to_vmem [thread:$0]  (!%p2416_p12), %s2815_s4, 64, %s470_s26, [#allocation5]  }
  0x36   : > { %p2160_p10 = pnand %p2159_p5, %p2153_p6 }
  0x38   : > { %2163 = shalt.err (!%p2160_p10)
}
  0x39   : > { %s2816_s8 = sld [smem:[#allocation25_spill]]  ;;  %p2817_p2 = scmp.ne.s32.totalorder %s2813_s24, 0 }
  0x3a   : > { %p2818_p3 = scmp.eq.s32.totalorder (!%p2817_p2), %s2380_s0, 0 }
  0x3b   : > { %537 = sbr.rel (%p2817_p2) target bundleno = 3626 (0xe2a), region = 92 }
  0x3f   : > { %1996 = dma.hbm_to_vmem [thread:$0]  (!%p2416_p12), %s2816_s8, 64, %s490_s20, [#allocation8]  }
  0x40   : > { %2207 = dma.done.wait (%p2818_p3), [#allocation5], 64   ;;  %p2819_p13 = pmov %p2818_p3 }
  0x41   : > { %p2820_p9 = pmov %p2818_p3 }
  0x42   : > { %2209 = vsyncadd (%p2819_p13), [#allocation5], 4294967232 }
  0x43   : > { %2211 = dma.done.wait (%p2820_p9), [#allocation8], 64   ;;  %p2821_p5 = pmov %p2818_p3 }
  0x44   : > { %p594_p6 = scmp.lt.s32.totalorder %s2380_s0, 1  ;;  %vm600_vm0 = vcmask 1043456   ;;  %vm601_vm1 = vcmask 261124   ;;  %v2236_v0 = vmov 0.0   ;;  %s2822_s20 = sld [smem:[#allocation17_spill]]  ;;  %vm618_vm3 = vcmask 278744  }
  0x45   : > { %2213 = vsyncadd (%p2821_p5), [#allocation8], 4294967232  ;;  %604 = vst [vmem:[#allocation3 + $0x30] sm:$0xff] %v2236_v0  ;;  %1884 = vmatprep.subr.mxu0 %v2236_v0  ;;  %1905 = vmatprep.subr.mxu1 %v2236_v0  ;;  %s2237_s25 = smov 27   ;;  %s2238_s19 = smov 37   ;;  %vm625_vm4 = vcmask 360744  }
  0x46   : > { %vm602_vm2 = vmor %vm601_vm1, %vm600_vm0  ;;  %s595_s29 = scalar_select %p594_p6, %s2380_s0, 1  ;;  %605 = vst [vmem:[#allocation3] sm:$0xff] %v2236_v0  ;;  %vm632_vm5 = vcmask 442744   ;;  %vm639_vm6 = vcmask 524744   ;;  %vm646_vm7 = vcmask 606744   ;;  %vm653_vm8 = vcmask 688744  }
  0x47   : > { %603 = vst.msk [vmem:[#allocation2] sm:$0xff] %vm602_vm2, %v2236_v0  ;;  %606 = vst [vmem:[#allocation3 + $0x18] sm:$0xff] %v2236_v0  ;;  %s2239_s22 = smov 47   ;;  %s2242_s24 = smov 77   ;;  %vm660_vm9 = vcmask 770744   ;;  %vm667_vm10 = vcmask 852744  }
  0x48   : > { %607 = vst [vmem:[#allocation3 + $0x10] sm:$0xff] %v2236_v0  ;;  %608 = vst [vmem:[#allocation3 + $0x20] sm:$0xff] %v2236_v0  ;;  %s1947_s1 = smul.u32 24, %s595_s29  ;;  %s2240_s29 = smov 57   ;;  %vm776_vm11 = vcmask 916480   ;;  %vm779_vm12 = vcmask 1042432  }
  0x49   : > { %609 = vst [vmem:[#allocation3 + $0x28] sm:$0xff] %v2236_v0  ;;  %610 = vst [vmem:[#allocation3 + $0x40] sm:$0xff] %v2236_v0  ;;  %s2243_s26 = smov 87   ;;  %s2823_s3 = sld [smem:[#allocation20_spill]]  ;;  %v2246_v62 = vmov 0   ;;  %vm845_vm13 = vcmask 130048  }
  0x4a   : > { %611 = vst [vmem:[#allocation3 + $0x38] sm:$0xff] %v2236_v0  ;;  %612 = vst [vmem:[#allocation3 + $0x8] sm:$0xff] %v2236_v0  ;;  %s2466_s21 = scalar_lea.vmem %s2822_s20, %s1947_s1  ;;  %s2241_s1 = smov 67   ;;  %2068 = vset.pattern.permute.xlu1 %v2246_v62  ;;  %2067 = vset.pattern.permute.xlu0 %v2246_v62  ;;  %vm849_vm14 = vcmask 1042560   ;;  %vm850_vm15 = vcmask 129028   ;;  %vm2256_vm2 = vmmov 0  }
  0x4b   : > { %v1836_v1 = vld [vmem:[%s2466_s21 + $0x10] sm:$0x1]  ;;  %v613_v2 = vld [vmem:[%s2466_s21] sm:$0x1]  ;;  %v620_v3 = vld [vmem:[%s2466_s21 + $0x1] sm:$0x1]  ;;  %1902 = vmatprep.mubr.msk.f32.mxu0 %vm2256_vm2, %v2236_v0  ;;  %1923 = vmatprep.mubr.msk.f32.mxu1 %vm2256_vm2, %v2236_v0 }
  0x4c   : > { %721 = vrot.lane.b32.xlu1 %v1836_v1, %s2237_s25  ;;  %615 = vrot.lane.b32.xlu0 %v613_v2, %s2237_s25  ;;  %v1828_v4 = vld [vmem:[%s2466_s21 + $0x8] sm:$0x1]  ;;  %v1837_v5 = vld [vmem:[%s2466_s21 + $0x11] sm:$0x1]  ;;  %s2244_s20 = smov 97   ;;  %vm851_vm1 = vmor %vm850_vm15, %vm849_vm14  ;;  %s2827_s5 = sld [smem:[#allocation22_spill]] }
  0x4d   : > { %v1829_v6 = vld [vmem:[%s2466_s21 + $0x9] sm:$0x1]  ;;  %v1830_v7 = vld [vmem:[%s2466_s21 + $0xa] sm:$0x1]  ;;  %v627_v8 = vld [vmem:[%s2466_s21 + $0x2] sm:$0x1] }
  0x4e   : > { %v634_v9 = vld [vmem:[%s2466_s21 + $0x3] sm:$0x1]  ;;  %v1838_v10 = vld [vmem:[%s2466_s21 + $0x12] sm:$0x1]  ;;  %v1839_v11 = vld [vmem:[%s2466_s21 + $0x13] sm:$0x1] }
  0x4f   : > { %v1831_v12 = vld [vmem:[%s2466_s21 + $0xb] sm:$0x1]  ;;  %v1832_v13 = vld [vmem:[%s2466_s21 + $0xc] sm:$0x1]  ;;  %v641_v14 = vld [vmem:[%s2466_s21 + $0x4] sm:$0x1] }
  0x50   : > { %622 = vrot.lane.b32.xlu1 %v620_v3, %s2238_s19  ;;  %672 = vrot.lane.b32.xlu0 %v1828_v4, %s2237_s25  ;;  %v648_v15 = vld [vmem:[%s2466_s21 + $0x5] sm:$0x1]  ;;  %v1840_v16 = vld [vmem:[%s2466_s21 + $0x14] sm:$0x1]  ;;  %s2828_s7 = sld [smem:[#allocation24_spill]]  ;;  %vm1106_vm14 = vcmask 1043584  }
  0x51   : > { %v1841_v17 = vld [vmem:[%s2466_s21 + $0x15] sm:$0x1]  ;;  %v1833_v18 = vld [vmem:[%s2466_s21 + $0xd] sm:$0x1]  ;;  %v1834_v19 = vld [vmem:[%s2466_s21 + $0xe] sm:$0x1] }
  0x52   : > { %v655_v20 = vld [vmem:[%s2466_s21 + $0x6] sm:$0x1]  ;;  %v662_v21 = vld [vmem:[%s2466_s21 + $0x7] sm:$0x1]  ;;  %v1842_v22 = vld [vmem:[%s2466_s21 + $0x16] sm:$0x1] }
  0x53   : > { %v1843_v23 = vld [vmem:[%s2466_s21 + $0x17] sm:$0x1]  ;;  %v1835_v24 = vld [vmem:[%s2466_s21 + $0xf] sm:$0x1]  ;;  %s2774_s21 = smov 112   ;;  %s2829_s6 = sld [smem:[#allocation23_spill]] }
  0x54   : > { %727 = vrot.lane.b32.xlu1 %v1837_v5, %s2238_s19  ;;  %678 = vrot.lane.b32.xlu0 %v1829_v6, %s2238_s19  ;;  %v769_v61 = vld [vmem:[%s2823_s3] sm:$0x7]  ;;  %vm1107_vm15 = vcmask 130052   ;;  %s2840_s4 = smov 123   ;;  %s2841_s9 = sld [smem:[#allocation26_spill]] }
  0x55   : > { %s2842_s11 = sld [smem:[#allocation28_spill]]  ;;  %p2844_p12 = scmp.ne.s32.totalorder %s2810_s2, 0 }
  0x56   : > { %s2843_s10 = sld [smem:[#allocation27_spill]] }
  0x58   : > { %684 = vrot.lane.b32.xlu1 %v1830_v7, %s2239_s22  ;;  %629 = vrot.lane.b32.xlu0 %v627_v8, %s2239_s22 }
  0x5c   : > { %636 = vrot.lane.b32.xlu1 %v634_v9, %s2240_s29  ;;  %733 = vrot.lane.b32.xlu0 %v1838_v10, %s2239_s22 }
  0x60   : > { %739 = vrot.lane.b32.xlu1 %v1839_v11, %s2240_s29  ;;  %690 = vrot.lane.b32.xlu0 %v1831_v12, %s2240_s29 }
  0x64   : > { %696 = vrot.lane.b32.xlu1 %v1832_v13, %s2241_s1  ;;  %643 = vrot.lane.b32.xlu0 %v641_v14, %s2241_s1 }
  0x68   : > { %650 = vrot.lane.b32.xlu1 %v648_v15, %s2242_s24  ;;  %745 = vrot.lane.b32.xlu0 %v1840_v16, %s2241_s1  ;;  %s2824_s1 = sld [smem:[#allocation19_spill]] }
  0x6c   : > { %751 = vrot.lane.b32.xlu1 %v1841_v17, %s2242_s24  ;;  %702 = vrot.lane.b32.xlu0 %v1833_v18, %s2242_s24 }
  0x6e   : > { %v768_v63 = vld [vmem:[%s2824_s1] sm:$0x7] }
  0x70   : > { %708 = vrot.lane.b32.xlu1 %v1834_v19, %s2243_s26  ;;  %657 = vrot.lane.b32.xlu0 %v655_v20, %s2243_s26 }
  0x74   : > { %664 = vrot.lane.b32.xlu1 %v662_v21, %s2244_s20  ;;  %757 = vrot.lane.b32.xlu0 %v1842_v22, %s2243_s26 }
  0x78   : > { %763 = vrot.lane.b32.xlu1 %v1843_v23, %s2244_s20  ;;  %714 = vrot.lane.b32.xlu0 %v1835_v24, %s2244_s20  ;;  %s2825_s20 = sld [smem:[#allocation18_spill]] }
  0x7e   : > { %v2507_v1 = vld [vmem:[%s2825_s20] ss:$0 sm:$0xff] }
  0xbe   : > { %v722_v25 = vpop.permute.xlu1 %721  ;;  %v616_v26 = vpop.permute.xlu0 %615 }
  0xbf   : > { %724 = vst.msk [vmem:[#allocation2 + $0x2] sm:$0x1] %vm618_vm3, %v722_v25  ;;  %619 = vst.msk [vmem:[#allocation2] sm:$0x1] %vm618_vm3, %v616_v26 }
  0xc2   : > { %v623_v27 = vpop.permute.xlu1 %622  ;;  %v673_v28 = vpop.permute.xlu0 %672 }
  0xc3   : > { %626 = vst.msk [vmem:[#allocation2] sm:$0x1] %vm625_vm4, %v623_v27 }
  0xc4   : > { %675 = vst.msk [vmem:[#allocation2 + $0x1] sm:$0x1] %vm618_vm3, %v673_v28  ;;  %vm925_vm3 = vcmask 842752  }
  0xc6   : > { %v728_v29 = vpop.permute.xlu1 %727  ;;  %v679_v30 = vpop.permute.xlu0 %678 }
  0xc7   : > { %730 = vst.msk [vmem:[#allocation2 + $0x2] sm:$0x1] %vm625_vm4, %v728_v29  ;;  %681 = vst.msk [vmem:[#allocation2 + $0x1] sm:$0x1] %vm625_vm4, %v679_v30  ;;  %vm914_vm4 = vcmask 908288  }
  0xca   : > { %v685_v31 = vpop.permute.xlu1 %684  ;;  %v630_v32 = vpop.permute.xlu0 %629 }
  0xcb   : > { %687 = vst.msk [vmem:[#allocation2 + $0x1] sm:$0x1] %vm632_vm5, %v685_v31  ;;  %633 = vst.msk [vmem:[#allocation2] sm:$0x1] %vm632_vm5, %v630_v32 }
  0xce   : > { %v637_v33 = vpop.permute.xlu1 %636  ;;  %v734_v34 = vpop.permute.xlu0 %733 }
  0xcf   : > { %640 = vst.msk [vmem:[#allocation2] sm:$0x1] %vm639_vm6, %v637_v33 }
  0xd0   : > { %736 = vst.msk [vmem:[#allocation2 + $0x2] sm:$0x1] %vm632_vm5, %v734_v34  ;;  %vm947_vm5 = vcmask 826368  }
  0xd2   : > { %v740_v35 = vpop.permute.xlu1 %739  ;;  %v691_v36 = vpop.permute.xlu0 %690 }
  0xd3   : > { %742 = vst.msk [vmem:[#allocation2 + $0x2] sm:$0x1] %vm639_vm6, %v740_v35  ;;  %693 = vst.msk [vmem:[#allocation2 + $0x1] sm:$0x1] %vm639_vm6, %v691_v36  ;;  %vm936_vm6 = vcmask 834560  }
  0xd6   : > { %v697_v37 = vpop.permute.xlu1 %696  ;;  %v644_v38 = vpop.permute.xlu0 %643 }
  0xd7   : > { %699 = vst.msk [vmem:[#allocation2 + $0x1] sm:$0x1] %vm646_vm7, %v697_v37  ;;  %647 = vst.msk [vmem:[#allocation2] sm:$0x1] %vm646_vm7, %v644_v38 }
  0xda   : > { %v651_v39 = vpop.permute.xlu1 %650  ;;  %v746_v40 = vpop.permute.xlu0 %745 }
  0xdb   : > { %654 = vst.msk [vmem:[#allocation2] sm:$0x1] %vm653_vm8, %v651_v39 }
  0xdc   : > { %748 = vst.msk [vmem:[#allocation2 + $0x2] sm:$0x1] %vm646_vm7, %v746_v40  ;;  %vm893_vm7 = vcmask 924672  }
  0xde   : > { %v752_v41 = vpop.permute.xlu1 %751  ;;  %v703_v42 = vpop.permute.xlu0 %702 }
  0xdf   : > { %754 = vst.msk [vmem:[#allocation2 + $0x2] sm:$0x1] %vm653_vm8, %v752_v41  ;;  %705 = vst.msk [vmem:[#allocation2 + $0x1] sm:$0x1] %vm653_vm8, %v703_v42  ;;  %vm882_vm8 = vcmask 990208  }
  0xe2   : > { %v709_v43 = vpop.permute.xlu1 %708  ;;  %v658_v44 = vpop.permute.xlu0 %657 }
  0xe3   : > { %711 = vst.msk [vmem:[#allocation2 + $0x1] sm:$0x1] %vm660_vm9, %v709_v43  ;;  %661 = vst.msk [vmem:[#allocation2] sm:$0x1] %vm660_vm9, %v658_v44 }
  0xe6   : > { %v665_v45 = vpop.permute.xlu1 %664  ;;  %v758_v46 = vpop.permute.xlu0 %757 }
  0xe7   : > { %668 = vst.msk [vmem:[#allocation2] sm:$0x1] %vm667_vm10, %v665_v45 }
  0xe8   : > { %760 = vst.msk [vmem:[#allocation2 + $0x2] sm:$0x1] %vm660_vm9, %v758_v46  ;;  %vm871_vm9 = vcmask 998400  }
  0xea   : > { %v764_v47 = vpop.permute.xlu1 %763  ;;  %v715_v48 = vpop.permute.xlu0 %714 }
  0xeb   : > { %766 = vst.msk [vmem:[#allocation2 + $0x2] sm:$0x1] %vm667_vm10, %v764_v47  ;;  %717 = vst.msk [vmem:[#allocation2 + $0x1] sm:$0x1] %vm667_vm10, %v715_v48  ;;  %v961_v48 = vld [vmem:[%s2827_s5] sm:$0xf] }
  0xec   : > { %vm860_vm10 = vcmask 1006592  }
  0xf2   : > { %v767_v49 = vld [vmem:[#allocation2] sm:$0x77] }
  0xf3   : > { %772 = vrot.lane.b32.xlu0 %v767_v49, %s2774_s21  ;;  %v771_v50 = vcombine.high %v767_v49, %v767_v49  ;;  %v790_v51 = vmul.f32 %v767_v49, %v767_v49 }
  0xf5   : > { %774 = vrot.lane.b32.xlu1 %v771_v50, %s2774_s21  ;;  %v792_v52 = vcombine.high %v790_v51, %v790_v51 }
  0xf7   : > { %793 = vrot.lane.b32.xlu0 %v790_v51, %s2774_s21 }
  0xf9   : > { %795 = vrot.lane.b32.xlu1 %v792_v52, %s2774_s21  ;;  %s2776_s21 = smov 16  }
 0x165   : > { %v773_v53 = vpop.permute.xlu0 %772 }
 0x167   : > { %v775_v54 = vpop.permute.xlu1 %774 }
 0x168   : > { %v777_v55 = vsel %vm776_vm11, %v773_v53, %v775_v54 }
 0x169   : > { %v780_v56 = vsel %vm779_vm12, %v777_v55, 0.0  ;;  %v794_v57 = vpop.permute.xlu0 %793 }
 0x16a   : > { %781 = vadd.xlane.f32.xlu0 %v780_v56 }
 0x16b   : > { %v796_v58 = vpop.permute.xlu1 %795 }
 0x16c   : > { %v797_v59 = vsel %vm776_vm11, %v794_v57, %v796_v58 }
 0x16d   : > { %v799_v60 = vsel %vm779_vm12, %v797_v59, 0.0  ;;  %vm967_vm12 = vcmask 588800  }
 0x16e   : > { %800 = vadd.xlane.f32.xlu1 %v799_v60 }
 0x17f   : > { %833 = vperm.xlu1 %2068, %v769_v61  }
 0x180   : > { %827 = vperm.xlu0 %2067, %v768_v63  }
 0x183   : > { %842 = vrot.lane.b32.xlu1 %v2507_v1, %s2776_s21 }
 0x1f3   : > { %v782_v2 = vpop.xlane.xlu0 %781 }
 0x1f4   : > { %v783_v3 = vrot.slane %v782_v2, 4 }
 0x1f6   : > { %v784_v4 = vadd.f32 %v783_v3, %v782_v2 }
 0x1f7   : > { %v801_v5 = vpop.xlane.xlu1 %800 }
 0x1f8   : > { %v785_v6 = vrot.slane %v784_v4, 2  ;;  %v802_v7 = vrot.slane %v801_v5, 4 }
 0x1fa   : > { %v803_v8 = vadd.f32 %v802_v7, %v801_v5  ;;  %v786_v9 = vadd.f32 %v785_v6, %v784_v4 }
 0x1fb   : > { %v834_v18 = vpop.permute.xlu1 %833  ;;  %v828_v23 = vpop.permute.xlu0 %827 }
 0x1fc   : > { %v804_v10 = vrot.slane %v803_v8, 2  ;;  %v787_v11 = vrot.slane %v786_v9, 1 }
 0x1fe   : > { %v788_v12 = vadd.f32 %v787_v11, %v786_v9  ;;  %v805_v13 = vadd.f32 %v804_v10, %v803_v8 }
 0x1ff   : > { %v843_v21 = vpop.permute.xlu1 %842 }
 0x200   : > { %1948 = vpush %v788_v12  ;;  %v806_v14 = vrot.slane %v805_v13, 1  ;;  %v844_v25 = vrot.slane %v843_v21, 4 }
 0x202   : > { %v807_v15 = vadd.f32 %v806_v14, %v805_v13  ;;  %v846_v28 = vsel %vm845_vm13, %v844_v25, %v843_v21 }
 0x204   : > { %1950 = vpush %v807_v15 }
 0x231   : > { %s1949_s25 = spop %1948 }
 0x232   : > { %s811_s19 = smul.f32 0.0052083335, %s1949_s25  ;;  %s2792_s25 = smov 101  }
 0x234   : > { %s815_s22 = smul.f32 %s811_s19, %s811_s19  ;;  %v821_v19 = vstv %s811_s19  ;;  %s2782_s19 = smov 102  }
 0x235   : > { %s1951_s29 = spop %1950  ;;  %v822_v20 = vsub.f32 %v767_v49, %v821_v19 }
 0x236   : > { %s814_s1 = smul.f32 0.0052083335, %s1951_s29  ;;  %s2826_s29 = smov 112  }
 0x238   : > { %s816_s24 = ssub.f32 %s814_s1, %s815_s22  ;;  %s2778_s22 = smov 111  }
 0x239   : > { %s2790_s1 = smov 113  }
 0x23a   : > { %s817_s26 = sadd.f32 1e-05, %s816_s24  ;;  %s2788_s24 = smov 121  }
 0x23c   : > { %v818_v16 = vstv %s817_s26  ;;  %s2786_s26 = smov 122  }
 0x23d   : > { %2081 = vrsqrt.f32 %v818_v16 }
 0x24a   : > { %v2082_v17 = vpop.eup %2081 }
 0x24b   : > { %1952 = vpush %v2082_v17 }
 0x27c   : > { %s1953_s21 = spop %1952 }
 0x27d   : > { %v823_v22 = vstv %s1953_s21  ;;  %s2780_s21 = smov 103  }
 0x27e   : > { %v824_v24 = vmul.f32 %v823_v22, %v822_v20  ;;  %v951_v22 = vld [vmem:[#allocation4] sm:$0xf] }
 0x280   : > { %v830_v26 = vmul.f32 %v828_v23, %v824_v24 }
 0x282   : > { %v836_v27 = vadd.f32 %v834_v18, %v830_v26 }
 0x284   : > { %v848_v29 = vmul.f32 %v846_v28, %v836_v27 }
 0x286   : > { %852 = vst.msk [vmem:[#allocation2] sm:$0x77] %vm851_vm1, %v848_v29  ;;  %vm2569_vm1 = vmor %vm1107_vm15, %vm1106_vm14 }
 0x28d   : > { %v940_v30 = vld [vmem:[#allocation2] sm:$0x77] }
 0x28e   : > { %v918_v31 = vld [vmem:[#allocation2] sm:$0x77]  ;;  %943 = vrot.lane.b32.xlu1 %v940_v30, %s2792_s25  ;;  %v942_v43 = vcombine.high %v940_v30, %v940_v30 }
 0x28f   : > { %v920_v32 = vcombine.high %v918_v31, %v918_v31  ;;  %v907_v33 = vld [vmem:[#allocation2] sm:$0x77] }
 0x290   : > { %v929_v34 = vld [vmem:[#allocation2] sm:$0x77]  ;;  %v909_v35 = vcombine.high %v907_v33, %v907_v33 }
 0x291   : > { %923 = vrot.lane.b32.xlu0 %v920_v32, %s2780_s21  ;;  %v897_v36 = vld [vmem:[#allocation2] sm:$0x77]  ;;  %v931_v46 = vcombine.high %v929_v34, %v929_v34 }
 0x292   : > { %932 = vrot.lane.b32.xlu1 %v929_v34, %s2782_s19  ;;  %v899_v37 = vcombine.high %v897_v36, %v897_v36  ;;  %v886_v38 = vld [vmem:[#allocation2] sm:$0x77] }
 0x293   : > { %v888_v39 = vcombine.high %v886_v38, %v886_v38  ;;  %v875_v40 = vld [vmem:[#allocation2] sm:$0x77] }
 0x294   : > { %v877_v41 = vcombine.high %v875_v40, %v875_v40  ;;  %v864_v42 = vld [vmem:[#allocation2] sm:$0x77] }
 0x295   : > { %912 = vrot.lane.b32.xlu0 %v909_v35, %s2778_s22  ;;  %v866_v44 = vcombine.high %v864_v42, %v864_v42  ;;  %v853_v45 = vld [vmem:[#allocation2] sm:$0x77] }
 0x296   : > { %921 = vrot.lane.b32.xlu1 %v918_v31, %s2780_s21  ;;  %v855_v47 = vcombine.high %v853_v45, %v853_v45  ;;  %v1044_v32 = vld [vmem:[%s2828_s7] sm:$0xf] }
 0x299   : > { %902 = vrot.lane.b32.xlu0 %v899_v37, %s2826_s29 }
 0x29a   : > { %910 = vrot.lane.b32.xlu1 %v907_v33, %s2778_s22  ;;  %s2784_s22 = smov 123   ;;  %v1043_v33 = vld [vmem:[%s2829_s6] sm:$0xf] }
 0x29d   : > { %891 = vrot.lane.b32.xlu0 %v888_v39, %s2790_s1 }
 0x29e   : > { %900 = vrot.lane.b32.xlu1 %v897_v36, %s2826_s29 }
 0x2a1   : > { %880 = vrot.lane.b32.xlu0 %v877_v41, %s2788_s24 }
 0x2a2   : > { %945 = vrot.lane.b32.xlu1 %v942_v43, %s2792_s25 }
 0x2a5   : > { %869 = vrot.lane.b32.xlu0 %v866_v44, %s2786_s26 }
 0x2a6   : > { %934 = vrot.lane.b32.xlu1 %v931_v46, %s2782_s19 }
 0x2a9   : > { %858 = vrot.lane.b32.xlu0 %v855_v47, %s2784_s22 }
 0x2aa   : > { %889 = vrot.lane.b32.xlu1 %v886_v38, %s2790_s1 }
 0x2ae   : > { %878 = vrot.lane.b32.xlu1 %v875_v40, %s2788_s24 }
 0x2b2   : > { %867 = vrot.lane.b32.xlu1 %v864_v42, %s2786_s26 }
 0x2b6   : > { %856 = vrot.lane.b32.xlu1 %v853_v45, %s2784_s22 }
 0x2ba   : > { %964 = vperm.xlu1 %2068, %v961_v48  }
 0x300   : > { %v944_v49 = vpop.permute.xlu1 %943 }
 0x303   : > { %v924_v50 = vpop.permute.xlu0 %923 }
 0x304   : > { %v933_v51 = vpop.permute.xlu1 %932 }
 0x307   : > { %v913_v54 = vpop.permute.xlu0 %912 }
 0x308   : > { %v922_v52 = vpop.permute.xlu1 %921 }
 0x309   : > { %v926_v53 = vsel %vm925_vm3, %v922_v52, %v924_v50 }
 0x30a   : > { %928 = vst [vmem:[#allocation3 + $0x40] sm:$0x7] %v926_v53 }
 0x30b   : > { %v903_v57 = vpop.permute.xlu0 %902 }
 0x30c   : > { %v911_v55 = vpop.permute.xlu1 %910 }
 0x30d   : > { %v915_v56 = vsel %vm914_vm4, %v911_v55, %v913_v54 }
 0x30e   : > { %917 = vst [vmem:[#allocation3 + $0x28] sm:$0x7] %v915_v56 }
 0x30f   : > { %v892_v62 = vpop.permute.xlu0 %891 }
 0x310   : > { %v901_v58 = vpop.permute.xlu1 %900 }
 0x311   : > { %v904_v59 = vsel %vm776_vm11, %v901_v58, %v903_v57  ;;  %v958_v11 = vld [vmem:[#allocation3 + $0x40] sm:$0xff] }
 0x312   : > { %906 = vst [vmem:[#allocation3 + $0x20] sm:$0x7] %v904_v59 }
 0x313   : > { %v881_v3 = vpop.permute.xlu0 %880 }
 0x314   : > { %v946_v60 = vpop.permute.xlu1 %945 }
 0x315   : > { %v948_v61 = vsel %vm947_vm5, %v944_v49, %v946_v60  ;;  %v957_v14 = vld [vmem:[#allocation3 + $0x28] sm:$0xff] }
 0x316   : > { %950 = vst [vmem:[#allocation3 + $0x8] sm:$0x7] %v948_v61 }
 0x317   : > { %v870_v10 = vpop.permute.xlu0 %869 }
 0x318   : > { %v935_v63 = vpop.permute.xlu1 %934 }
 0x319   : > { %v937_v2 = vsel %vm936_vm6, %v933_v51, %v935_v63  ;;  %v956_v15 = vld [vmem:[#allocation3 + $0x20] sm:$0xff] }
 0x31a   : > { %939 = vst [vmem:[#allocation3 + $0x38] sm:$0x7] %v937_v2 }
 0x31b   : > { %v859_v16 = vpop.permute.xlu0 %858 }
 0x31c   : > { %v890_v4 = vpop.permute.xlu1 %889 }
 0x31d   : > { %v894_v5 = vsel %vm893_vm7, %v890_v4, %v892_v62  ;;  %v960_v6 = vld [vmem:[#allocation3 + $0x8] sm:$0xff]  ;;  %v1454_v4 = vld [vmem:[%s2761_s13] sm:$0xf] }
 0x31e   : > { %896 = vst [vmem:[#allocation3 + $0x10] sm:$0x7] %v894_v5  ;;  %1885 = vmatpush3.msra.mxu0 %v960_v6 }
 0x31f   : > { %1886 = vmatprep.subr.mxu0 %v2236_v0 }
 0x320   : > { %v879_v7 = vpop.permute.xlu1 %878 }
 0x321   : > { %v883_v8 = vsel %vm882_vm8, %v879_v7, %v881_v3  ;;  %v959_v9 = vld [vmem:[#allocation3 + $0x38] sm:$0xff] }
 0x322   : > { %885 = vst [vmem:[#allocation3 + $0x18] sm:$0x7] %v883_v8  ;;  %1887 = vmatpush3.msra.mxu0 %v959_v9  ;;  %v1210_v8 = vld [vmem:[%s2841_s9] sm:$0xf] }
 0x323   : > { %1888 = vmatprep.subr.mxu0 %v2236_v0 }
 0x324   : > { %1889 = vmatpush3.msra.mxu0 %v958_v11  ;;  %v868_v12 = vpop.permute.xlu1 %867 }
 0x325   : > { %v872_v13 = vsel %vm871_vm9, %v868_v12, %v870_v10  ;;  %1890 = vmatprep.subr.mxu0 %v2236_v0  ;;  %v955_v19 = vld [vmem:[#allocation3 + $0x10] sm:$0xff] }
 0x326   : > { %874 = vst [vmem:[#allocation3] sm:$0x7] %v872_v13  ;;  %1891 = vmatpush3.msra.mxu0 %v957_v14 }
 0x327   : > { %1892 = vmatprep.subr.mxu0 %v2236_v0 }
 0x328   : > { %1893 = vmatpush3.msra.mxu0 %v956_v15  ;;  %v857_v17 = vpop.permute.xlu1 %856 }
 0x329   : > { %v861_v18 = vsel %vm860_vm10, %v857_v17, %v859_v16  ;;  %1894 = vmatprep.subr.mxu0 %v2236_v0  ;;  %v954_v20 = vld [vmem:[#allocation3 + $0x18] sm:$0xff] }
 0x32a   : > { %863 = vst [vmem:[#allocation3 + $0x30] sm:$0x7] %v861_v18  ;;  %1895 = vmatpush3.msra.mxu0 %v955_v19 }
 0x32b   : > { %1896 = vmatprep.subr.mxu0 %v2236_v0 }
 0x32c   : > { %1897 = vmatpush3.msra.mxu0 %v954_v20 }
 0x32d   : > { %1898 = vmatprep.subr.mxu0 %v2236_v0  ;;  %v953_v21 = vld [vmem:[#allocation3] sm:$0xff] }
 0x32e   : > { %1899 = vmatpush3.msra.mxu0 %v953_v21 }
 0x32f   : > { %1900 = vmatprep.subr.mxu0 %v2236_v0 }
 0x331   : > { %v952_v23 = vld [vmem:[#allocation3 + $0x30] sm:$0xff] }
 0x332   : > { %1901 = vmatpush3.msra.mxu0 %v952_v23 }
 0x333   : > { %1903 = vmatmul.mubr.msk.f32.vlgmr.msra.gmra.mxu0 %vm967_vm12, %v951_v22  ;;  %1926 = vmatprep.subr.mxu0 %v2236_v0 }
 0x334   : > { %1944 = vmatprep.mubr.msk.f32.mxu0 %vm2256_vm2, %v2236_v0  ;;  %vm1727_vm2 = vcmask 24600  }
 0x335   : > { %v965_v24 = vpop.permute.xlu1 %964 }
 0x3f3   : > { %v1037_v25 = vpop.f32.mrf.mxu0 }
 0x3f4   : > { %v1038_v26 = vadd.f32 %v1037_v25, %v965_v24 }
 0x3f5   : > { %v1904_v27 = vpop.f32.mrf.mxu0 }
 0x3f6   : > { %v1042_v28 = vmul.f32 %v2507_v1, %v1038_v26 }
 0x3f8   : > { %v1045_v29 = vsel %vm600_vm0, %v1042_v28, 0.0  ;;  %v1055_v30 = vmul.f32 %v1042_v28, %v1042_v28 }
 0x3f9   : > { %1046 = vadd.xlane.f32.xlu0 %v1045_v29 }
 0x3fa   : > { %v1056_v31 = vsel %vm600_vm0, %v1055_v30, 0.0 }
 0x3fb   : > { %1057 = vadd.xlane.f32.xlu1 %v1056_v31 }
 0x40c   : > { %1090 = vperm.xlu1 %2068, %v1044_v32  }
 0x40f   : > { %1084 = vperm.xlu0 %2067, %v1043_v33  }
 0x482   : > { %v1047_v34 = vpop.xlane.xlu0 %1046 }
 0x483   : > { %v1048_v35 = vrot.slane %v1047_v34, 4 }
 0x484   : > { %v1058_v36 = vpop.xlane.xlu1 %1057 }
 0x485   : > { %v1049_v37 = vadd.f32 %v1048_v35, %v1047_v34  ;;  %v1059_v38 = vrot.slane %v1058_v36, 4 }
 0x487   : > { %v1050_v39 = vrot.slane %v1049_v37, 2  ;;  %v1060_v40 = vadd.f32 %v1059_v38, %v1058_v36 }
 0x488   : > { %v1091_v56 = vpop.permute.xlu1 %1090 }
 0x489   : > { %v1061_v41 = vrot.slane %v1060_v40, 2  ;;  %v1051_v42 = vadd.f32 %v1050_v39, %v1049_v37 }
 0x48a   : > { %v1085_v54 = vpop.permute.xlu0 %1084 }
 0x48b   : > { %v1052_v43 = vrot.slane %v1051_v42, 1  ;;  %v1062_v44 = vadd.f32 %v1061_v41, %v1060_v40 }
 0x48d   : > { %v1053_v45 = vadd.f32 %v1052_v43, %v1051_v42  ;;  %v1063_v46 = vrot.slane %v1062_v44, 1 }
 0x48f   : > { %1954 = vpush %v1053_v45  ;;  %v1064_v47 = vadd.f32 %v1063_v46, %v1062_v44  ;;  %v1200_v44 = vld [vmem:[#allocation7] sm:$0xf] }
 0x491   : > { %1956 = vpush %v1064_v47 }
 0x4c0   : > { %s1955_s21 = spop %1954 }
 0x4c1   : > { %s1068_s22 = smul.f32 0.00390625, %s1955_s21  ;;  %s2836_s21 = smov 111  }
 0x4c2   : > { %s1957_s26 = spop %1956 }
 0x4c3   : > { %s1072_s19 = smul.f32 %s1068_s22, %s1068_s22  ;;  %v1078_v50 = vstv %s1068_s22  ;;  %s2837_s22 = smov 113  }
 0x4c4   : > { %s1071_s24 = smul.f32 0.00390625, %s1957_s26  ;;  %v1079_v51 = vsub.f32 %v1042_v28, %v1078_v50  ;;  %s2838_s26 = smov 121  }
 0x4c6   : > { %s1073_s1 = ssub.f32 %s1071_s24, %s1072_s19  ;;  %s2835_s24 = smov 103  }
 0x4c7   : > { %s2839_s19 = smov 122  }
 0x4c8   : > { %s1074_s25 = sadd.f32 1e-05, %s1073_s1  ;;  %s2834_s1 = smov 102  }
 0x4ca   : > { %v1075_v48 = vstv %s1074_s25  ;;  %s2830_s25 = smov 16  }
 0x4cb   : > { %2083 = vrsqrt.f32 %v1075_v48 }
 0x4d8   : > { %v2084_v49 = vpop.eup %2083 }
 0x4d9   : > { %1958 = vpush %v2084_v49 }
 0x50a   : > { %s1959_s3 = spop %1958 }
 0x50b   : > { %v1080_v52 = vstv %s1959_s3  ;;  %s2833_s3 = smov 101  }
 0x50c   : > { %v1081_v53 = vmul.f32 %v1080_v52, %v1079_v51 }
 0x50e   : > { %v1087_v55 = vmul.f32 %v1085_v54, %v1081_v53  ;;  %v1291_v54 = vld [vmem:[%s2842_s11] sm:$0xf] }
 0x510   : > { %v1093_v57 = vadd.f32 %v1091_v56, %v1087_v55  ;;  %v1290_v55 = vld [vmem:[%s2843_s10] sm:$0xf] }
 0x512   : > { %v1095_v58 = vmul.f32 0.70710677, %v1093_v57  ;;  %v1094_v60 = vmul.f32 0.5, %v1093_v57 }
 0x514   : > { %2085 = verf.f32 %v1095_v58 }
 0x521   : > { %v2086_v59 = vpop.eup %2085 }
 0x522   : > { %v1097_v61 = vadd.f32 1.0, %v2086_v59 }
 0x524   : > { %v1098_v62 = vmul.f32 %v1097_v61, %v1094_v60 }
 0x526   : > { %v1099_v63 = vmul.f32 %v2507_v1, %v1098_v62 }
 0x528   : > { %1101 = vrot.lane.b32.xlu0 %v1099_v63, %s2830_s25 }
 0x59a   : > { %v1102_v2 = vpop.permute.xlu0 %1101 }
 0x59b   : > { %v1103_v3 = vrot.slane %v1102_v2, 4 }
 0x59d   : > { %v1104_v5 = vsel %vm845_vm13, %v1103_v3, %v1102_v2 }
 0x59e   : > { %1109 = vst.msk [vmem:[#allocation2] sm:$0xff] %vm2569_vm1, %v1104_v5 }
 0x5a5   : > { %v1190_v6 = vld [vmem:[#allocation2] sm:$0xff] }
 0x5a6   : > { %1193 = vrot.lane.b32.xlu1 %v1190_v6, %s2833_s3  ;;  %v1192_v7 = vcombine.high %v1190_v6, %v1190_v6 }
 0x5a8   : > { %1195 = vrot.lane.b32.xlu0 %v1192_v7, %s2833_s3 }
 0x5aa   : > { %1183 = vrot.lane.b32.xlu1 %v1190_v6, %s2834_s1 }
 0x5ac   : > { %1185 = vrot.lane.b32.xlu0 %v1192_v7, %s2834_s1 }
 0x5ae   : > { %1173 = vrot.lane.b32.xlu1 %v1190_v6, %s2835_s24 }
 0x5b0   : > { %1175 = vrot.lane.b32.xlu0 %v1192_v7, %s2835_s24 }
 0x5b2   : > { %1163 = vrot.lane.b32.xlu1 %v1190_v6, %s2836_s21 }
 0x5b4   : > { %1165 = vrot.lane.b32.xlu0 %v1192_v7, %s2836_s21 }
 0x5b6   : > { %1153 = vrot.lane.b32.xlu1 %v1190_v6, %s2826_s29 }
 0x5b8   : > { %1155 = vrot.lane.b32.xlu0 %v1192_v7, %s2826_s29 }
 0x5ba   : > { %1143 = vrot.lane.b32.xlu1 %v1190_v6, %s2837_s22 }
 0x5bc   : > { %1145 = vrot.lane.b32.xlu0 %v1192_v7, %s2837_s22 }
 0x5be   : > { %1133 = vrot.lane.b32.xlu1 %v1190_v6, %s2838_s26 }
 0x5c0   : > { %1135 = vrot.lane.b32.xlu0 %v1192_v7, %s2838_s26 }
 0x5c2   : > { %1123 = vrot.lane.b32.xlu1 %v1190_v6, %s2839_s19 }
 0x5c4   : > { %1125 = vrot.lane.b32.xlu0 %v1192_v7, %s2839_s19 }
 0x5c6   : > { %1113 = vrot.lane.b32.xlu1 %v1190_v6, %s2840_s4 }
 0x5c8   : > { %1115 = vrot.lane.b32.xlu0 %v1192_v7, %s2840_s4 }
 0x5ca   : > { %1213 = vperm.xlu1 %2068, %v1210_v8  }
 0x618   : > { %v1194_v9 = vpop.permute.xlu1 %1193 }
 0x61a   : > { %v1196_v10 = vpop.permute.xlu0 %1195 }
 0x61b   : > { %v1197_v11 = vsel %vm947_vm5, %v1194_v9, %v1196_v10 }
 0x61c   : > { %1199 = vst [vmem:[#allocation3 + $0x8] sm:$0xf] %v1197_v11  ;;  %v1184_v12 = vpop.permute.xlu1 %1183 }
 0x61e   : > { %v1186_v13 = vpop.permute.xlu0 %1185 }
 0x61f   : > { %v1187_v14 = vsel %vm936_vm6, %v1184_v12, %v1186_v13 }
 0x620   : > { %1189 = vst [vmem:[#allocation3 + $0x38] sm:$0xf] %v1187_v14  ;;  %v1174_v15 = vpop.permute.xlu1 %1173 }
 0x622   : > { %v1176_v16 = vpop.permute.xlu0 %1175 }
 0x623   : > { %v1177_v17 = vsel %vm925_vm3, %v1174_v15, %v1176_v16  ;;  %v1209_v18 = vld [vmem:[#allocation3 + $0x8] sm:$0xff] }
 0x624   : > { %1179 = vst [vmem:[#allocation3 + $0x40] sm:$0xf] %v1177_v17  ;;  %1906 = vmatpush3.msra.mxu1 %v1209_v18  ;;  %v1164_v19 = vpop.permute.xlu1 %1163 }
 0x625   : > { %1907 = vmatprep.subr.mxu1 %v2236_v0 }
 0x626   : > { %v1166_v20 = vpop.permute.xlu0 %1165 }
 0x627   : > { %v1167_v21 = vsel %vm914_vm4, %v1164_v19, %v1166_v20  ;;  %v1208_v22 = vld [vmem:[#allocation3 + $0x38] sm:$0xff] }
 0x628   : > { %1169 = vst [vmem:[#allocation3 + $0x28] sm:$0xf] %v1167_v21  ;;  %1908 = vmatpush3.msra.mxu1 %v1208_v22  ;;  %v1154_v23 = vpop.permute.xlu1 %1153 }
 0x629   : > { %1909 = vmatprep.subr.mxu1 %v2236_v0 }
 0x62a   : > { %v1156_v24 = vpop.permute.xlu0 %1155 }
 0x62b   : > { %v1157_v25 = vsel %vm776_vm11, %v1154_v23, %v1156_v24  ;;  %v1207_v26 = vld [vmem:[#allocation3 + $0x40] sm:$0xff] }
 0x62c   : > { %1159 = vst [vmem:[#allocation3 + $0x20] sm:$0xf] %v1157_v25  ;;  %1910 = vmatpush3.msra.mxu1 %v1207_v26  ;;  %v1144_v27 = vpop.permute.xlu1 %1143 }
 0x62d   : > { %1911 = vmatprep.subr.mxu1 %v2236_v0 }
 0x62e   : > { %v1146_v28 = vpop.permute.xlu0 %1145 }
 0x62f   : > { %v1147_v29 = vsel %vm893_vm7, %v1144_v27, %v1146_v28  ;;  %v1206_v30 = vld [vmem:[#allocation3 + $0x28] sm:$0xff] }
 0x630   : > { %1149 = vst [vmem:[#allocation3 + $0x10] sm:$0xf] %v1147_v29  ;;  %1912 = vmatpush3.msra.mxu1 %v1206_v30  ;;  %v1134_v31 = vpop.permute.xlu1 %1133 }
 0x631   : > { %1913 = vmatprep.subr.mxu1 %v2236_v0 }
 0x632   : > { %v1136_v32 = vpop.permute.xlu0 %1135 }
 0x633   : > { %v1137_v33 = vsel %vm882_vm8, %v1134_v31, %v1136_v32  ;;  %v1205_v34 = vld [vmem:[#allocation3 + $0x20] sm:$0xff] }
 0x634   : > { %1139 = vst [vmem:[#allocation3 + $0x18] sm:$0xf] %v1137_v33  ;;  %1914 = vmatpush3.msra.mxu1 %v1205_v34  ;;  %v1124_v35 = vpop.permute.xlu1 %1123 }
 0x635   : > { %1915 = vmatprep.subr.mxu1 %v2236_v0 }
 0x636   : > { %v1126_v36 = vpop.permute.xlu0 %1125 }
 0x637   : > { %v1127_v37 = vsel %vm871_vm9, %v1124_v35, %v1126_v36  ;;  %v1204_v38 = vld [vmem:[#allocation3 + $0x10] sm:$0xff] }
 0x638   : > { %1129 = vst [vmem:[#allocation3] sm:$0xf] %v1127_v37  ;;  %1916 = vmatpush3.msra.mxu1 %v1204_v38  ;;  %v1114_v39 = vpop.permute.xlu1 %1113 }
 0x639   : > { %1917 = vmatprep.subr.mxu1 %v2236_v0 }
 0x63a   : > { %v1116_v40 = vpop.permute.xlu0 %1115 }
 0x63b   : > { %v1117_v41 = vsel %vm860_vm10, %v1114_v39, %v1116_v40  ;;  %v1203_v42 = vld [vmem:[#allocation3 + $0x18] sm:$0xff] }
 0x63c   : > { %1119 = vst [vmem:[#allocation3 + $0x30] sm:$0xf] %v1117_v41  ;;  %1918 = vmatpush3.msra.mxu1 %v1203_v42 }
 0x63d   : > { %1919 = vmatprep.subr.mxu1 %v2236_v0 }
 0x63f   : > { %v1202_v43 = vld [vmem:[#allocation3] sm:$0xff] }
 0x640   : > { %1920 = vmatpush3.msra.mxu1 %v1202_v43 }
 0x641   : > { %1921 = vmatprep.subr.mxu1 %v2236_v0 }
 0x643   : > { %v1201_v45 = vld [vmem:[#allocation3 + $0x30] sm:$0xff] }
 0x644   : > { %1922 = vmatpush3.msra.mxu1 %v1201_v45 }
 0x645   : > { %1924 = vmatmul.mubr.msk.f32.vlgmr.msra.gmra.mxu1 %vm967_vm12, %v1200_v44  ;;  %v1214_v46 = vpop.permute.xlu1 %1213 }
 0x705   : > { %v1285_v47 = vpop.f32.mrf.mxu1 }
 0x706   : > { %v1286_v48 = vadd.f32 %v1285_v47, %v1214_v46 }
 0x707   : > { %v1925_v49 = vpop.f32.mrf.mxu1 }
 0x708   : > { %v1289_v50 = vmul.f32 %v2507_v1, %v1286_v48 }
 0x70a   : > { %v1292_v51 = vsel %vm600_vm0, %v1289_v50, 0.0  ;;  %v1302_v52 = vmul.f32 %v1289_v50, %v1289_v50 }
 0x70b   : > { %1293 = vadd.xlane.f32.xlu0 %v1292_v51 }
 0x70c   : > { %v1303_v53 = vsel %vm600_vm0, %v1302_v52, 0.0 }
 0x70d   : > { %1304 = vadd.xlane.f32.xlu1 %v1303_v53 }
 0x71e   : > { %1337 = vperm.xlu1 %2068, %v1291_v54  }
 0x721   : > { %1331 = vperm.xlu0 %2067, %v1290_v55  }
 0x794   : > { %v1294_v56 = vpop.xlane.xlu0 %1293 }
 0x795   : > { %v1295_v57 = vrot.slane %v1294_v56, 4 }
 0x796   : > { %v1305_v58 = vpop.xlane.xlu1 %1304 }
 0x797   : > { %v1296_v59 = vadd.f32 %v1295_v57, %v1294_v56  ;;  %v1306_v60 = vrot.slane %v1305_v58, 4 }
 0x799   : > { %v1297_v61 = vrot.slane %v1296_v59, 2  ;;  %v1307_v62 = vadd.f32 %v1306_v60, %v1305_v58 }
 0x79a   : > { %v1338_v17 = vpop.permute.xlu1 %1337 }
 0x79b   : > { %v1308_v63 = vrot.slane %v1307_v62, 2  ;;  %v1298_v2 = vadd.f32 %v1297_v61, %v1296_v59 }
 0x79c   : > { %v1332_v15 = vpop.permute.xlu0 %1331 }
 0x79d   : > { %v1299_v3 = vrot.slane %v1298_v2, 1  ;;  %v1309_v5 = vadd.f32 %v1308_v63, %v1307_v62 }
 0x79f   : > { %v1300_v6 = vadd.f32 %v1299_v3, %v1298_v2  ;;  %v1310_v7 = vrot.slane %v1309_v5, 1  ;;  %v1444_v3 = vld [vmem:[%s2760_s12] sm:$0xf] }
 0x7a1   : > { %1960 = vpush %v1300_v6  ;;  %v1311_v8 = vadd.f32 %v1310_v7, %v1309_v5 }
 0x7a3   : > { %1962 = vpush %v1311_v8 }
 0x7d2   : > { %s1961_s5 = spop %1960 }
 0x7d3   : > { %s1315_s7 = smul.f32 0.00390625, %s1961_s5 }
 0x7d4   : > { %s1963_s8 = spop %1962 }
 0x7d5   : > { %s1319_s6 = smul.f32 %s1315_s7, %s1315_s7  ;;  %v1325_v11 = vstv %s1315_s7 }
 0x7d6   : > { %s1318_s9 = smul.f32 0.00390625, %s1963_s8  ;;  %v1326_v12 = vsub.f32 %v1289_v50, %v1325_v11  ;;  %s2259_s8 = smov 125  }
 0x7d8   : > { %s1320_s10 = ssub.f32 %s1318_s9, %s1319_s6  ;;  %s2260_s6 = smov 2  }
 0x7d9   : > { %s2261_s9 = smov 1  }
 0x7da   : > { %s1321_s11 = sadd.f32 1e-05, %s1320_s10  ;;  %s2262_s10 = smov 3  }
 0x7dc   : > { %v1322_v9 = vstv %s1321_s11 }
 0x7dd   : > { %2087 = vrsqrt.f32 %v1322_v9 }
 0x7ea   : > { %v2088_v10 = vpop.eup %2087 }
 0x7eb   : > { %1964 = vpush %v2088_v10 }
 0x81c   : > { %s1965_s23 = spop %1964 }
 0x81d   : > { %v1327_v13 = vstv %s1965_s23  ;;  %s1851_s23 = sshll.u32 %s2380_s0, 4 }
 0x81e   : > { %v1328_v14 = vmul.f32 %v1327_v13, %v1326_v12  ;;  %v1535_v13 = vld [vmem:[%s2763_s15] sm:$0xf] }
 0x820   : > { %v1334_v16 = vmul.f32 %v1332_v15, %v1328_v14  ;;  %v1534_v14 = vld [vmem:[%s2762_s14] sm:$0xf] }
 0x822   : > { %v1340_v18 = vadd.f32 %v1338_v17, %v1334_v16 }
 0x824   : > { %v1342_v19 = vmul.f32 0.70710677, %v1340_v18  ;;  %v1341_v21 = vmul.f32 0.5, %v1340_v18 }
 0x826   : > { %2089 = verf.f32 %v1342_v19 }
 0x833   : > { %v2090_v20 = vpop.eup %2089 }
 0x834   : > { %v1344_v22 = vadd.f32 1.0, %v2090_v20 }
 0x836   : > { %v1345_v23 = vmul.f32 %v1344_v22, %v1341_v21 }
 0x838   : > { %v1346_v24 = vmul.f32 %v2507_v1, %v1345_v23 }
 0x83a   : > { %1348 = vrot.lane.b32.xlu0 %v1346_v24, %s2830_s25 }
 0x8ac   : > { %v1349_v25 = vpop.permute.xlu0 %1348 }
 0x8ad   : > { %v1350_v26 = vrot.slane %v1349_v25, 4 }
 0x8af   : > { %v1351_v27 = vsel %vm845_vm13, %v1350_v26, %v1349_v25  ;;  %vm1725_vm13 = vcmask 16400  }
 0x8b0   : > { %1353 = vst.msk [vmem:[#allocation2] sm:$0xff] %vm2569_vm1, %v1351_v27 }
 0x8b7   : > { %v1434_v28 = vld [vmem:[#allocation2] sm:$0xff] }
 0x8b8   : > { %1437 = vrot.lane.b32.xlu1 %v1434_v28, %s2833_s3  ;;  %v1436_v29 = vcombine.high %v1434_v28, %v1434_v28 }
 0x8ba   : > { %1439 = vrot.lane.b32.xlu0 %v1436_v29, %s2833_s3 }
 0x8bc   : > { %1427 = vrot.lane.b32.xlu1 %v1434_v28, %s2834_s1 }
 0x8be   : > { %1429 = vrot.lane.b32.xlu0 %v1436_v29, %s2834_s1 }
 0x8c0   : > { %1417 = vrot.lane.b32.xlu1 %v1434_v28, %s2835_s24 }
 0x8c2   : > { %1419 = vrot.lane.b32.xlu0 %v1436_v29, %s2835_s24 }
 0x8c4   : > { %1407 = vrot.lane.b32.xlu1 %v1434_v28, %s2836_s21 }
 0x8c6   : > { %1409 = vrot.lane.b32.xlu0 %v1436_v29, %s2836_s21 }
 0x8c8   : > { %1397 = vrot.lane.b32.xlu1 %v1434_v28, %s2826_s29 }
 0x8ca   : > { %1399 = vrot.lane.b32.xlu0 %v1436_v29, %s2826_s29 }
 0x8cc   : > { %1387 = vrot.lane.b32.xlu1 %v1434_v28, %s2837_s22 }
 0x8ce   : > { %1389 = vrot.lane.b32.xlu0 %v1436_v29, %s2837_s22 }
 0x8d0   : > { %1377 = vrot.lane.b32.xlu1 %v1434_v28, %s2838_s26 }
 0x8d2   : > { %1379 = vrot.lane.b32.xlu0 %v1436_v29, %s2838_s26 }
 0x8d4   : > { %1367 = vrot.lane.b32.xlu1 %v1434_v28, %s2839_s19 }
 0x8d6   : > { %1369 = vrot.lane.b32.xlu0 %v1436_v29, %s2839_s19 }
 0x8d8   : > { %1357 = vrot.lane.b32.xlu1 %v1434_v28, %s2840_s4 }
 0x8da   : > { %1359 = vrot.lane.b32.xlu0 %v1436_v29, %s2840_s4  ;;  %s592_s4 = sand.u32 1, %s2224_s28  }
 0x8db   : > { %s593_s11 = scalar_lea.vmem [#allocation9], %s592_s4 }
 0x8dc   : > { %1457 = vperm.xlu1 %2068, %v1454_v4   ;;  %s1742_s29 = sshll.u32 %s593_s11, 4  ;;  %s1743_s29 = int_to_ptr.vmem [resolvable:$true] %s1742_s29 }
 0x92a   : > { %v1438_v30 = vpop.permute.xlu1 %1437 }
 0x92c   : > { %v1440_v31 = vpop.permute.xlu0 %1439 }
 0x92d   : > { %v1441_v32 = vsel %vm947_vm5, %v1438_v30, %v1440_v31 }
 0x92e   : > { %1443 = vst [vmem:[#allocation3 + $0x8] sm:$0xf] %v1441_v32  ;;  %v1428_v33 = vpop.permute.xlu1 %1427 }
 0x930   : > { %v1430_v34 = vpop.permute.xlu0 %1429 }
 0x931   : > { %v1431_v35 = vsel %vm936_vm6, %v1428_v33, %v1430_v34 }
 0x932   : > { %1433 = vst [vmem:[#allocation3 + $0x38] sm:$0xf] %v1431_v35  ;;  %v1418_v36 = vpop.permute.xlu1 %1417 }
 0x934   : > { %v1420_v37 = vpop.permute.xlu0 %1419 }
 0x935   : > { %v1421_v38 = vsel %vm925_vm3, %v1418_v36, %v1420_v37  ;;  %v1453_v39 = vld [vmem:[#allocation3 + $0x8] sm:$0xff] }
 0x936   : > { %1423 = vst [vmem:[#allocation3 + $0x40] sm:$0xf] %v1421_v38  ;;  %1927 = vmatpush3.msra.mxu0 %v1453_v39  ;;  %v1408_v40 = vpop.permute.xlu1 %1407 }
 0x937   : > { %1928 = vmatprep.subr.mxu0 %v2236_v0 }
 0x938   : > { %v1410_v41 = vpop.permute.xlu0 %1409 }
 0x939   : > { %v1411_v42 = vsel %vm914_vm4, %v1408_v40, %v1410_v41  ;;  %v1452_v43 = vld [vmem:[#allocation3 + $0x38] sm:$0xff] }
 0x93a   : > { %1413 = vst [vmem:[#allocation3 + $0x28] sm:$0xf] %v1411_v42  ;;  %1929 = vmatpush3.msra.mxu0 %v1452_v43  ;;  %v1398_v44 = vpop.permute.xlu1 %1397  ;;  %v1848_v42 = vld [vmem:[%s2764_s16 + $0x4] sm:$0xf]  ;;  %v1591_v43 = vld [vmem:[%s2764_s16] sm:$0xf] }
 0x93b   : > { %1930 = vmatprep.subr.mxu0 %v2236_v0 }
 0x93c   : > { %v1400_v45 = vpop.permute.xlu0 %1399 }
 0x93d   : > { %v1401_v46 = vsel %vm776_vm11, %v1398_v44, %v1400_v45  ;;  %v1451_v47 = vld [vmem:[#allocation3 + $0x40] sm:$0xff]  ;;  %v2111_v44 = vld [vmem:[%s2825_s20] ss:$0 sm:$0xff]  ;;  %vm1723_vm11 = vcmask 8200  }
 0x93e   : > { %1403 = vst [vmem:[#allocation3 + $0x20] sm:$0xf] %v1401_v46  ;;  %1931 = vmatpush3.msra.mxu0 %v1451_v47  ;;  %v1388_v48 = vpop.permute.xlu1 %1387  ;;  %v1849_v46 = vld [vmem:[%s2764_s16 + $0x8] sm:$0xf] }
 0x93f   : > { %1932 = vmatprep.subr.mxu0 %v2236_v0 }
 0x940   : > { %v1390_v49 = vpop.permute.xlu0 %1389 }
 0x941   : > { %v1391_v50 = vsel %vm893_vm7, %v1388_v48, %v1390_v49  ;;  %v1450_v51 = vld [vmem:[#allocation3 + $0x28] sm:$0xff] }
 0x942   : > { %1393 = vst [vmem:[#allocation3 + $0x10] sm:$0xf] %v1391_v50  ;;  %1933 = vmatpush3.msra.mxu0 %v1450_v51  ;;  %v1378_v52 = vpop.permute.xlu1 %1377 }
 0x943   : > { %1934 = vmatprep.subr.mxu0 %v2236_v0 }
 0x944   : > { %v1380_v53 = vpop.permute.xlu0 %1379 }
 0x945   : > { %v1381_v54 = vsel %vm882_vm8, %v1378_v52, %v1380_v53  ;;  %v1449_v55 = vld [vmem:[#allocation3 + $0x20] sm:$0xff] }
 0x946   : > { %1383 = vst [vmem:[#allocation3 + $0x18] sm:$0xf] %v1381_v54  ;;  %1935 = vmatpush3.msra.mxu0 %v1449_v55  ;;  %v1368_v56 = vpop.permute.xlu1 %1367  ;;  %v1850_v52 = vld [vmem:[%s2764_s16 + $0xc] sm:$0xf] }
 0x947   : > { %1936 = vmatprep.subr.mxu0 %v2236_v0 }
 0x948   : > { %v1370_v57 = vpop.permute.xlu0 %1369 }
 0x949   : > { %v1371_v58 = vsel %vm871_vm9, %v1368_v56, %v1370_v57  ;;  %v1448_v59 = vld [vmem:[#allocation3 + $0x10] sm:$0xff] }
 0x94a   : > { %1373 = vst [vmem:[#allocation3] sm:$0xf] %v1371_v58  ;;  %1937 = vmatpush3.msra.mxu0 %v1448_v59  ;;  %v1358_v60 = vpop.permute.xlu1 %1357 }
 0x94b   : > { %1938 = vmatprep.subr.mxu0 %v2236_v0 }
 0x94c   : > { %v1360_v61 = vpop.permute.xlu0 %1359 }
 0x94d   : > { %v1361_v62 = vsel %vm860_vm10, %v1358_v60, %v1360_v61  ;;  %v1447_v63 = vld [vmem:[#allocation3 + $0x18] sm:$0xff] }
 0x94e   : > { %1363 = vst [vmem:[#allocation3 + $0x30] sm:$0xf] %v1361_v62  ;;  %1939 = vmatpush3.msra.mxu0 %v1447_v63 }
 0x94f   : > { %1940 = vmatprep.subr.mxu0 %v2236_v0 }
 0x951   : > { %v1446_v2 = vld [vmem:[#allocation3] sm:$0xff] }
 0x952   : > { %1941 = vmatpush3.msra.mxu0 %v1446_v2 }
 0x953   : > { %1942 = vmatprep.subr.mxu0 %v2236_v0 }
 0x955   : > { %v1445_v5 = vld [vmem:[#allocation3 + $0x30] sm:$0xff] }
 0x956   : > { %1943 = vmatpush3.msra.mxu0 %v1445_v5 }
 0x957   : > { %1945 = vmatmul.mubr.msk.f32.vlgmr.msra.gmra.mxu0 %vm967_vm12, %v1444_v3  ;;  %v1458_v6 = vpop.permute.xlu1 %1457 }
 0xa17   : > { %v1529_v7 = vpop.f32.mrf.mxu0 }
 0xa18   : > { %v1530_v8 = vadd.f32 %v1529_v7, %v1458_v6 }
 0xa19   : > { %v1946_v9 = vpop.f32.mrf.mxu0 }
 0xa1a   : > { %v1533_v10 = vmul.f32 %v2507_v1, %v1530_v8 }
 0xa1c   : > { %v1536_v11 = vsel %vm600_vm0, %v1533_v10, 0.0  ;;  %v1546_v12 = vmul.f32 %v1533_v10, %v1533_v10 }
 0xa1d   : > { %1537 = vadd.xlane.f32.xlu0 %v1536_v11 }
 0xa1e   : > { %v1547_v0 = vsel %vm600_vm0, %v1546_v12, 0.0 }
 0xa1f   : > { %1548 = vadd.xlane.f32.xlu1 %v1547_v0 }
 0xa30   : > { %1581 = vperm.xlu1 %2068, %v1535_v13  }
 0xa33   : > { %1575 = vperm.xlu0 %2067, %v1534_v14  }
 0xaa6   : > { %v1538_v15 = vpop.xlane.xlu0 %1537 }
 0xaa7   : > { %v1539_v16 = vrot.slane %v1538_v15, 4 }
 0xaa8   : > { %v1549_v1 = vpop.xlane.xlu1 %1548 }
 0xaa9   : > { %v1540_v17 = vadd.f32 %v1539_v16, %v1538_v15  ;;  %v1550_v18 = vrot.slane %v1549_v1, 4 }
 0xaab   : > { %v1541_v19 = vrot.slane %v1540_v17, 2  ;;  %v1551_v20 = vadd.f32 %v1550_v18, %v1549_v1 }
 0xaac   : > { %v1582_v35 = vpop.permute.xlu1 %1581 }
 0xaad   : > { %v1552_v21 = vrot.slane %v1551_v20, 2  ;;  %v1542_v22 = vadd.f32 %v1541_v19, %v1540_v17 }
 0xaae   : > { %v1576_v33 = vpop.permute.xlu0 %1575 }
 0xaaf   : > { %v1543_v23 = vrot.slane %v1542_v22, 1  ;;  %v1553_v24 = vadd.f32 %v1552_v21, %v1551_v20  ;;  %v1603_v21 = vld [vmem:[%s2765_s17] sm:$0x1] }
 0xab1   : > { %v1544_v25 = vadd.f32 %v1543_v23, %v1542_v22  ;;  %v1554_v26 = vrot.slane %v1553_v24, 1 }
 0xab3   : > { %1966 = vpush %v1544_v25  ;;  %v1555_v27 = vadd.f32 %v1554_v26, %v1553_v24 }
 0xab5   : > { %1968 = vpush %v1555_v27 }
 0xae4   : > { %s1967_s1 = spop %1966 }
 0xae5   : > { %s1559_s24 = smul.f32 0.00390625, %s1967_s1  ;;  %s1740_s1 = scalar_lea.hbm %s2766_s18, %s1851_s23 }
 0xae6   : > { %s1969_s21 = spop %1968 }
 0xae7   : > { %s1563_s22 = smul.f32 %s1559_s24, %s1559_s24  ;;  %v1569_v4 = vstv %s1559_s24  ;;  %s1730_s24 = scalar_lea.sflag [#allocation6], %s592_s4 }
 0xae8   : > { %s1562_s26 = smul.f32 0.00390625, %s1969_s21  ;;  %v1570_v30 = vsub.f32 %v1533_v10, %v1569_v4 }
 0xaea   : > { %s1564_s19 = ssub.f32 %s1562_s26, %s1563_s22 }
 0xaec   : > { %s1565_s5 = sadd.f32 1e-05, %s1564_s19  ;;  %s2257_s19 = smov 127  }
 0xaee   : > { %v1566_v28 = vstv %s1565_s5  ;;  %s2258_s5 = smov 126  }
 0xaef   : > { %2091 = vrsqrt.f32 %v1566_v28 }
 0xafc   : > { %v2092_v29 = vpop.eup %2091 }
 0xafd   : > { %1970 = vpush %v2092_v29 }
 0xb2e   : > { %s1971_s7 = spop %1970 }
 0xb2f   : > { %v1571_v31 = vstv %s1971_s7 }
 0xb30   : > { %v1572_v32 = vmul.f32 %v1571_v31, %v1570_v30 }
 0xb32   : > { %v1578_v34 = vmul.f32 %v1576_v33, %v1572_v32 }
 0xb34   : > { %v1584_v36 = vadd.f32 %v1582_v35, %v1578_v34 }
 0xb36   : > { %v1586_v37 = vmul.f32 0.70710677, %v1584_v36  ;;  %v1585_v39 = vmul.f32 0.5, %v1584_v36 }
 0xb38   : > { %2093 = verf.f32 %v1586_v37 }
 0xb45   : > { %v2094_v38 = vpop.eup %2093 }
 0xb46   : > { %v1588_v40 = vadd.f32 1.0, %v2094_v38 }
 0xb48   : > { %v1589_v41 = vmul.f32 %v1588_v40, %v1585_v39 }
 0xb4a   : > { %v1590_v45 = vmul.f32 %v2111_v44, %v1589_v41 }
 0xb4c   : > { %v1608_v47 = vmul.f32 %v1848_v42, %v1590_v45  ;;  %v1592_v48 = vmul.f32 %v1591_v43, %v1590_v45  ;;  %v1623_v51 = vmul.f32 %v1849_v46, %v1590_v45  ;;  %v1638_v54 = vmul.f32 %v1850_v52, %v1590_v45 }
 0xb4e   : > { %v1609_v49 = vsel %vm600_vm0, %v1608_v47, 0.0  ;;  %v1593_v50 = vsel %vm600_vm0, %v1592_v48, 0.0  ;;  %v1624_v53 = vsel %vm600_vm0, %v1623_v51, 0.0  ;;  %v1639_v55 = vsel %vm600_vm0, %v1638_v54, 0.0 }
 0xb4f   : > { %1610 = vadd.xlane.f32.xlu1 %v1609_v49  ;;  %1594 = vadd.xlane.f32.xlu0 %v1593_v50  ;;  %vm1721_vm0 = vcmask 0  }
 0xb53   : > { %1625 = vadd.xlane.f32.xlu0 %v1624_v53 }
 0xb57   : > { %1640 = vadd.xlane.f32.xlu0 %v1639_v55 }
 0xbd8   : > { %v1611_v56 = vpop.xlane.xlu1 %1610  ;;  %v1595_v57 = vpop.xlane.xlu0 %1594 }
 0xbd9   : > { %v1612_v58 = vrot.slane %v1611_v56, 4  ;;  %v1596_v59 = vrot.slane %v1595_v57, 4 }
 0xbdb   : > { %v1613_v60 = vadd.f32 %v1612_v58, %v1611_v56  ;;  %v1597_v61 = vadd.f32 %v1596_v59, %v1595_v57 }
 0xbdc   : > { %v1626_v62 = vpop.xlane.xlu0 %1625 }
 0xbdd   : > { %v1614_v63 = vrot.slane %v1613_v60, 2  ;;  %v1598_v2 = vrot.slane %v1597_v61, 2  ;;  %v1627_v3 = vrot.slane %v1626_v62, 4 }
 0xbdf   : > { %v1628_v5 = vadd.f32 %v1627_v3, %v1626_v62  ;;  %v1599_v6 = vadd.f32 %v1598_v2, %v1597_v61  ;;  %v1615_v7 = vadd.f32 %v1614_v63, %v1613_v60 }
 0xbe0   : > { %v1641_v8 = vpop.xlane.xlu0 %1640 }
 0xbe1   : > { %v1629_v9 = vrot.slane %v1628_v5, 2  ;;  %v1642_v10 = vrot.slane %v1641_v8, 4  ;;  %v1600_v11 = vrot.slane %v1599_v6, 1  ;;  %v1616_v12 = vrot.slane %v1615_v7, 1 }
 0xbe3   : > { %v1643_v0 = vadd.f32 %v1642_v10, %v1641_v8  ;;  %v1601_v13 = vadd.f32 %v1600_v11, %v1599_v6  ;;  %v1617_v14 = vadd.f32 %v1616_v12, %v1615_v7  ;;  %v1630_v15 = vadd.f32 %v1629_v9, %v1628_v5 }
 0xbe5   : > { %v1644_v16 = vrot.slane %v1643_v0, 2  ;;  %1972 = vpush %v1601_v13  ;;  %v1631_v1 = vrot.slane %v1630_v15, 1 }
 0xbe6   : > { %1974 = vpush %v1617_v14 }
 0xbe7   : > { %v1632_v17 = vadd.f32 %v1631_v1, %v1630_v15  ;;  %v1645_v18 = vadd.f32 %v1644_v16, %v1643_v0 }
 0xbe9   : > { %1976 = vpush %v1632_v17  ;;  %v1646_v19 = vrot.slane %v1645_v18, 1 }
 0xbeb   : > { %v1647_v20 = vadd.f32 %v1646_v19, %v1645_v18 }
 0xbed   : > { %1978 = vpush %v1647_v20 }
 0xc16   : > { %s1973_s21 = spop %1972 }
 0xc17   : > { %v1604_v22 = vstv %s1973_s21  ;;  %s1975_s22 = spop %1974  ;;  %s2164_s21 = scalar_lea.vmem %s1743_s29, 16 }
 0xc18   : > { %v1605_v23 = vadd.f32 %v1604_v22, %v1603_v21  ;;  %v1619_v24 = vstv %s1975_s22  ;;  %p2165_p10 = scmp.ne.s32.totalorder %s1743_s29, %s2164_s21  ;;  %s2263_s22 = smov [#allocation9]  }
 0xc19   : > { %v1620_v25 = vadd.f32 %v1619_v24, %v1603_v21  ;;  %s2168_s0 = sshll.u32 %s2263_s22, 4  ;;  %s2169_s0 = int_to_ptr.vmem [resolvable:$false] %s2168_s0 }
 0xc1a   : > { %s1977_s26 = spop %1976  ;;  %p2166_p4 = pnand %p2165_p10, %p2844_p12 }
 0xc1b   : > { %1652 = vrot.lane.b32.xlu1 %v1620_v25, %s2257_s19  ;;  %v1634_v26 = vstv %s1977_s26  ;;  %s2170_s26 = scalar_lea.vmem %s2169_s0, 32  ;;  %p2171_p8 = scmp.lt.s32.totalorder %s1743_s29, %s2169_s0 }
 0xc1c   : > { %v1635_v27 = vadd.f32 %v1634_v26, %v1603_v21  ;;  %p2167_p7 = pneg %p2166_p4  ;;  %p2172_p11 = scmp.lt.s32.totalorder %s2170_s26, %s2164_s21 }
 0xc1e   : > { %1657 = vrot.lane.b32.xlu0 %v1635_v27, %s2258_s5  ;;  %s1979_s7 = spop %1978  ;;  %p2173_p0 = por %p2172_p11, %p2171_p8 }
 0xc1f   : > { %v1649_v28 = vstv %s1979_s7 }
 0xc20   : > { %v1650_v29 = vadd.f32 %v1649_v28, %v1603_v21  ;;  %p2174_p1 = pnand %p2173_p0, %p2167_p7 }
 0xc22   : > { %1662 = vrot.lane.b32.xlu1 %v1650_v29, %s2259_s8 }
 0xc8d   : > { %v1653_v4 = vpop.permute.xlu1 %1652 }
 0xc8e   : > { %v1655_v31 = vmax.f32 %v1605_v23, %v1653_v4 }
 0xc90   : > { %v1658_v30 = vpop.permute.xlu0 %1657 }
 0xc91   : > { %v1660_v32 = vmax.f32 %v1655_v31, %v1658_v30 }
 0xc94   : > { %v1663_v33 = vpop.permute.xlu1 %1662 }
 0xc95   : > { %v1665_v34 = vmax.f32 %v1660_v32, %v1663_v33 }
 0xc97   : > { %v1666_v35 = vsub.f32 %v1605_v23, %v1665_v34  ;;  %1676 = vrot.lane.b32.xlu0 %v1665_v34, %s2260_s6  ;;  %1670 = vrot.lane.b32.xlu1 %v1665_v34, %s2261_s9 }
 0xc99   : > { %v1667_v48 = vmul.f32 1.442695, %v1666_v35 }
 0xc9b   : > { %1682 = vrot.lane.b32.xlu1 %v1665_v34, %s2262_s10 }
 0xd09   : > { %v1677_v36 = vpop.permute.xlu0 %1676  ;;  %v1671_v37 = vpop.permute.xlu1 %1670 }
 0xd0a   : > { %v1679_v38 = vsub.f32 %v1635_v27, %v1677_v36  ;;  %v1673_v39 = vsub.f32 %v1620_v25, %v1671_v37 }
 0xd0c   : > { %v1680_v40 = vmul.f32 1.442695, %v1679_v38  ;;  %v1674_v41 = vmul.f32 1.442695, %v1673_v39 }
 0xd0d   : > { %v1683_v42 = vpop.permute.xlu1 %1682 }
 0xd0e   : > { %2095 = vpow2.f32 %v1680_v40  ;;  %v1685_v43 = vsub.f32 %v1650_v29, %v1683_v42 }
 0xd0f   : > { %2097 = vpow2.f32 %v1674_v41 }
 0xd10   : > { %v1686_v44 = vmul.f32 1.442695, %v1685_v43 }
 0xd12   : > { %2099 = vpow2.f32 %v1686_v44 }
 0xd13   : > { %2101 = vpow2.f32 %v1667_v48 }
 0xd1b   : > { %v2096_v45 = vpop.eup %2095 }
 0xd1c   : > { %v2098_v46 = vpop.eup %2097  ;;  %1694 = vrot.lane.b32.xlu1 %v2096_v45, %s2258_s5 }
 0xd1d   : > { %1689 = vrot.lane.b32.xlu0 %v2098_v46, %s2257_s19 }
 0xd1f   : > { %v2100_v47 = vpop.eup %2099 }
 0xd20   : > { %v2102_v49 = vpop.eup %2101 }
 0xd21   : > { %1699 = vrot.lane.b32.xlu0 %v2100_v47, %s2259_s8 }
 0xd8e   : > { %v1695_v52 = vpop.permute.xlu1 %1694 }
 0xd8f   : > { %v1690_v50 = vpop.permute.xlu0 %1689 }
 0xd90   : > { %v1692_v51 = vadd.f32 %v2102_v49, %v1690_v50 }
 0xd92   : > { %v1697_v53 = vadd.f32 %v1695_v52, %v1692_v51 }
 0xd93   : > { %v1700_v54 = vpop.permute.xlu0 %1699 }
 0xd94   : > { %v1702_v55 = vadd.f32 %v1700_v54, %v1697_v53 }
 0xd96   : > { %2103 = vrcp.f32 %v1702_v55  ;;  %1711 = vrot.lane.b32.xlu0 %v1702_v55, %s2260_s6  ;;  %1706 = vrot.lane.b32.xlu1 %v1702_v55, %s2261_s9 }
 0xd9a   : > { %1716 = vrot.lane.b32.xlu1 %v1702_v55, %s2262_s10 }
 0xda3   : > { %v2104_v56 = vpop.eup %2103 }
 0xda4   : > { %v1704_v57 = vmul.f32 %v2104_v56, %v2102_v49 }
 0xda6   : > { %1722 = vst.msk [vmem:[%s593_s11] sm:$0x1] %vm1721_vm0, %v1704_v57 }
 0xe08   : > { %v1712_v58 = vpop.permute.xlu0 %1711  ;;  %v1707_v59 = vpop.permute.xlu1 %1706 }
 0xe09   : > { %2105 = vrcp.f32 %v1712_v58 }
 0xe0a   : > { %2107 = vrcp.f32 %v1707_v59 }
 0xe0c   : > { %v1717_v60 = vpop.permute.xlu1 %1716 }
 0xe0d   : > { %2109 = vrcp.f32 %v1717_v60 }
 0xe16   : > { %v2106_v61 = vpop.eup %2105 }
 0xe17   : > { %v2108_v62 = vpop.eup %2107  ;;  %v1715_v63 = vmul.f32 %v2106_v61, %v2096_v45 }
 0xe18   : > { %v1710_v2 = vmul.f32 %v2108_v62, %v2098_v46 }
 0xe1a   : > { %v2110_v3 = vpop.eup %2109  ;;  %1724 = vst.msk [vmem:[%s593_s11] sm:$0x1] %vm1723_vm11, %v1710_v2 }
 0xe1b   : > { %v1720_v5 = vmul.f32 %v2110_v3, %v2100_v47  ;;  %1726 = vst.msk [vmem:[%s593_s11] sm:$0x1] %vm1725_vm13, %v1715_v63 }
 0xe1d   : > { %1728 = vst.msk [vmem:[%s593_s11] sm:$0x1] %vm1727_vm2, %v1720_v5 }
 0xe1e   : > { %2177 = shalt.err (!%p2174_p1)
}
 0xe1f   : > { %s2178_s19 = scalar_lea.hbm %s1740_s1, 16  ;;  %s2182_s8 = scalar_lea.hbm %s2766_s18, 32 }
 0xe20   : > { %p2179_p2 = scmp.ne.s32.totalorder %s1740_s1, %s2178_s19  ;;  %p2183_p9 = scmp.lt.s32.totalorder %s1740_s1, %s2766_s18 }
 0xe21   : > { %p2184_p5 = scmp.lt.s32.totalorder %s2182_s8, %s2178_s19 }
 0xe22   : > { %p2180_p3 = pnand %p2179_p2, %p2844_p12 }
 0xe23   : > { %p2185_p6 = por %p2184_p5, %p2183_p9 }
 0xe24   : > { %p2181_p13 = pneg %p2180_p3 }
 0xe26   : > { %p2186_p10 = pnand %p2185_p6, %p2181_p13 }
 0xe28   : > { %2189 = shalt.err (!%p2186_p10)
}
 0xe29   : > { %1988 = dma.vmem_to_hbm [thread:$0]  (%p2844_p12), %s1743_s29, 16, %s1740_s1, %s1730_s24  }
 0xe2a PF: > { %s2845_s10 = sld [smem:[#allocation16_spill]]  ;;  %p2005_p4 = scmp.ge.s32.totalorder %s2232_s30, 2 }
 0xe2b   : > { %s1754_s4 = sand.u32 1, %s2220_s27  }
 0xe2c   : > { %s1755_s11 = scalar_lea.sflag [#allocation6], %s1754_s4 }
 0xe30   : > { %p2846_p7 = scmp.ne.s32.totalorder %s2845_s10, 0 }
 0xe32   : > { %p1998_p8 = pnand %p2005_p4, %p2846_p7 }
 0xe34   : > { %p1999_p11 = pneg %p1998_p8 }
 0xe36   : > { %2215 = dma.done.wait (%p1999_p11), %s1755_s11, 16  }
 0xe37   : > { %2217 = vsyncadd (%p1999_p11), %s1755_s11, 4294967280  ;;  %s2847_s30 = sld [smem:[#allocation14_spill]]  ;;  %s2850_s27 = smov %s2224_s28 }
 0xe38   : > { %s2848_s23 = sld [smem:[#allocation13_spill]] }
 0xe39   : > { %s2849_s29 = sld [smem:[#allocation15_spill]] }
 0xe3d   : > { %p30_p0 = scmp.ge.s32.totalorder %s2847_s30, 4  }
 0xe3e   : > { %s2851_s28 = smov %s2848_s23 }
 0xe3f   :  { %32 = sbr.rel (!%p30_p0) target bundleno = 18 (0x12), region = 141 }
 0xe44   :  { %1759 = vsyncpa [#allocation5], 1 }
 0xe45   :  { %1761 = vsyncpa [#allocation5 + $0x1], 1 }
 0xe46   :  { %1762 = vsyncpa [#allocation8], 1 }
 0xe47   :  { %1763 = vsyncpa [#allocation6], 1 }
 0xe48   :  { %1765 = vsyncpa [#allocation6 + $0x1], 1 }

</bundles_post_ra>
